<compile_context>
chip_gen: v7x
topology: tpu7x:2x2x1
jax: 0.10.0
libtpu: 0.0.40
codegen_flags: <defaults>
</compile_context>

<pallas_src>
import math
from functools import partial

import jax
import jax.numpy as jnp
from jax.experimental import pallas as pl
from jax.experimental.pallas import tpu as pltpu


# ----------------------------- fused matmul (+bias, +relu) kernel -----------------------------

def _matmul_bias_kernel(act):
    def kernel(a_ref, w_ref, b_ref, o_ref):
        y = jnp.dot(a_ref[...], w_ref[...], preferred_element_type=jnp.float32)
        y = y + b_ref[...]
        if act == "relu":
            y = jnp.maximum(y, 0.0)
        o_ref[...] = y
    return kernel


def pallas_linear(x, w, b, act=None):
    """x:[M,K] f32, w:[K,N] f32, b:[N] f32 -> [M,N] f32.

    bf16 MXU inputs with f32 accumulation; output padded to a lane-dense width
    (multiple of 128) inside the kernel and sliced back here; rows tiled with
    remainder padding (no whole-matrix fallback)."""
    M, K = x.shape
    N = w.shape[1]
    Np = ((N + 127) // 128) * 128
    wp = jnp.pad(w, ((0, 0), (0, Np - N))).astype(jnp.bfloat16)
    bp = jnp.pad(b, (0, Np - N)).reshape(1, Np).astype(jnp.float32)
    xb = x.astype(jnp.bfloat16)

    if M <= 512:
        tm, Mp = M, M
    else:
        tm = 512
        Mp = ((M + tm - 1) // tm) * tm
        if Mp != M:
            xb = jnp.pad(xb, ((0, Mp - M), (0, 0)))

    out = pl.pallas_call(
        _matmul_bias_kernel(act),
        out_shape=jax.ShapeDtypeStruct((Mp, Np), jnp.float32),
        grid=(Mp // tm,),
        in_specs=[
            pl.BlockSpec((tm, K), lambda i: (i, 0)),
            pl.BlockSpec((K, Np), lambda i: (0, 0)),
            pl.BlockSpec((1, Np), lambda i: (0, 0)),
        ],
        out_specs=pl.BlockSpec((tm, Np), lambda i: (i, 0)),
        compiler_params=pltpu.CompilerParams(dimension_semantics=("parallel",)),
    )(xb, wp, bp)
    return out[:M, :N]


# ----------------------------- conv via im2col + Pallas matmul -----------------------------

# TODO(synk): im2col patch extraction (9 strided window gathers + 5-D transpose) stays in
# plain XLA; a stride-2 lane/sublane gather has no clean single-BlockSpec expression and is
# negligible at these sizes.
def im2col(x, k=3, s=2, pad=1):
    """x: [N, C, H, W] -> ([N*Ho*Wo, C*k*k], Ho, Wo), feature order (C, ki, kj)."""
    N, C, H, W = x.shape
    xp = jnp.pad(x, ((0, 0), (0, 0), (pad, pad), (pad, pad)))
    Hp, Wp = H + 2 * pad, W + 2 * pad
    Ho = (Hp - k) // s + 1
    Wo = (Wp - k) // s + 1
    cols = []
    for di in range(k):
        for dj in range(k):
            cols.append(xp[:, :, di:di + s * Ho:s, dj:dj + s * Wo:s])
    patches = jnp.stack(cols, axis=2)            # [N, C, k*k, Ho, Wo]
    patches = patches.transpose(0, 3, 4, 1, 2)   # [N, Ho, Wo, C, k*k]
    return patches.reshape(N * Ho * Wo, C * k * k), Ho, Wo


def conv3x3_s2(x, w, b, act="relu"):
    """x:[N,C,H,W], w:[O,C,3,3] (PyTorch layout), b:[O] -> [N,O,H//2,W//2]."""
    N = x.shape[0]
    O = w.shape[0]
    patches, Ho, Wo = im2col(x, 3, 2, 1)
    wmat = w.reshape(O, -1).T                    # [C*9, O]
    out = pallas_linear(patches, wmat, b, act=act)
    return out.reshape(N, Ho, Wo, O).transpose(0, 3, 1, 2)


# ----------------------------- fused decoder kernel (grid over layers) -----------------------------

def _make_decoder_kernel(d_model):
    scale = 1.0 / math.sqrt(d_model)

    def layernorm(x, g, b, eps=1e-5):
        mu = jnp.mean(x, axis=-1, keepdims=True)
        xc = x - mu
        var = jnp.mean(xc * xc, axis=-1, keepdims=True)
        return xc * jax.lax.rsqrt(var + eps) * g + b

    def attention(q, k, v):
        # contract last dims of q and k (no transpose of K); scale folded into q.
        s = jax.lax.dot_general(q * scale, k, (((1,), (1,)), ((), ())),
                                preferred_element_type=jnp.float32)
        s = s - jnp.max(s, axis=-1, keepdims=True)
        p = jnp.exp(s)
        denom = jnp.sum(p, axis=-1, keepdims=True)
        p = p * pl.reciprocal(denom, approx=True)
        return jnp.dot(p, v, preferred_element_type=jnp.float32)

    def kernel(qe_ref, mem_ref, memkv_ref,
               sa_w_ref, sa_b_ref, ca_w_ref, ca_b_ref,
               ffn1_w_ref, ffn1_b_ref, ffn2_w_ref, ffn2_b_ref,
               ln_g_ref, ln_b_ref,
               hs_ref, tgt_scr):
        l = pl.program_id(0)

        @pl.when(l == 0)
        def _():
            tgt_scr[...] = jnp.zeros_like(tgt_scr)

        tgt = tgt_scr[...]
        qe = qe_ref[...]
        mem = mem_ref[...]
        memkv = memkv_ref[...]
        f32 = jnp.float32

        def proj(x, w_ref, b_ref, j):
            return jnp.dot(x, w_ref[0, j], preferred_element_type=f32) + b_ref[0, j]

        # --- self-attention block ---
        q_in = tgt + qe
        q = proj(q_in, sa_w_ref, sa_b_ref, 0)
        k = proj(q_in, sa_w_ref, sa_b_ref, 1)
        v = proj(tgt, sa_w_ref, sa_b_ref, 2)
        sa = proj(attention(q, k, v), sa_w_ref, sa_b_ref, 3)
        tgt = layernorm(tgt + sa, ln_g_ref[0, 0], ln_b_ref[0, 0])

        # --- cross-attention block (memkv = mem + mem_pos precomputed once) ---
        q = proj(tgt + qe, ca_w_ref, ca_b_ref, 0)
        k = proj(memkv, ca_w_ref, ca_b_ref, 1)
        v = proj(mem, ca_w_ref, ca_b_ref, 2)
        ca = proj(attention(q, k, v), ca_w_ref, ca_b_ref, 3)
        tgt = layernorm(tgt + ca, ln_g_ref[0, 1], ln_b_ref[0, 1])

        # --- FFN block (dff intermediate stays in registers/VMEM) ---
        h = jnp.dot(tgt, ffn1_w_ref[0], preferred_element_type=f32) + ffn1_b_ref[0, 0]
        h = jnp.maximum(h, 0.0)
        f = jnp.dot(h, ffn2_w_ref[0], preferred_element_type=f32) + ffn2_b_ref[0, 0]
        tgt = layernorm(tgt + f, ln_g_ref[0, 2], ln_b_ref[0, 2])

        tgt_scr[...] = tgt
        hs_ref[...] = tgt

    return kernel


def run_decoder(params, qe, mem, memkv):
    num_layers, _, d, _ = params["sa_w"].shape
    nq = qe.shape[0]
    S = mem.shape[0]
    dff = params["ffn1_w"].shape[2]

    return pl.pallas_call(
        _make_decoder_kernel(d),
        out_shape=jax.ShapeDtypeStruct((nq, d), jnp.float32),
        grid=(num_layers,),
        in_specs=[
            pl.BlockSpec((nq, d), lambda l: (0, 0)),            # query_embed
            pl.BlockSpec((S, d), lambda l: (0, 0)),             # memory
            pl.BlockSpec((S, d), lambda l: (0, 0)),             # memory + pos
            pl.BlockSpec((1, 4, d, d), lambda l: (l, 0, 0, 0)),  # self-attn q/k/v/o weights
            pl.BlockSpec((1, 4, d), lambda l: (l, 0, 0)),        # self-attn biases
            pl.BlockSpec((1, 4, d, d), lambda l: (l, 0, 0, 0)),  # cross-attn q/k/v/o weights
            pl.BlockSpec((1, 4, d), lambda l: (l, 0, 0)),        # cross-attn biases
            pl.BlockSpec((1, d, dff), lambda l: (l, 0, 0)),      # ffn1 w
            pl.BlockSpec((1, 1, dff), lambda l: (l, 0, 0)),      # ffn1 b
            pl.BlockSpec((1, dff, d), lambda l: (l, 0, 0)),      # ffn2 w
            pl.BlockSpec((1, 1, d), lambda l: (l, 0, 0)),        # ffn2 b
            pl.BlockSpec((1, 3, d), lambda l: (l, 0, 0)),        # ln gammas
            pl.BlockSpec((1, 3, d), lambda l: (l, 0, 0)),        # ln betas
        ],
        out_specs=pl.BlockSpec((nq, d), lambda l: (0, 0)),       # resident across layers
        scratch_shapes=[pltpu.VMEM((nq, d), jnp.float32)],
        compiler_params=pltpu.CompilerParams(dimension_semantics=("arbitrary",)),
    )(qe, mem, memkv,
      params["sa_w"], params["sa_b"], params["ca_w"], params["ca_b"],
      params["ffn1_w"], params["ffn1_b"], params["ffn2_w"], params["ffn2_b"],
      params["ln_g"], params["ln_b"])


# ----------------------------- fused detection head kernel -----------------------------

def _make_head_kernel(nq, num_classes, out_width, eps=1e-5):
    def sigmoid(z):
        return 1.0 / (1.0 + jnp.exp(-z))

    def kernel(hs_ref, qe_ref, ref_w_ref, ref_b_ref, cls_w_ref, cls_b_ref,
               b1_w_ref, b1_b_ref, b2_w_ref, b2_b_ref, b3_w_ref, b3_b_ref, out_ref):
        f32 = jnp.float32
        hs = hs_ref[...]
        qe = qe_ref[...]

        # reference points from query embedding (decoder reference), as in module glue
        reference = sigmoid(jnp.dot(qe, ref_w_ref[...], preferred_element_type=f32)
                            + ref_b_ref[...])

        # class branch
        logits = jnp.dot(hs, cls_w_ref[...], preferred_element_type=f32) + cls_b_ref[...]
        probs = sigmoid(logits)

        # box MLP branch refined around inverse-sigmoid reference
        t = jnp.maximum(jnp.dot(hs, b1_w_ref[...], preferred_element_type=f32) + b1_b_ref[...], 0.0)
        t = jnp.maximum(jnp.dot(t, b2_w_ref[...], preferred_element_type=f32) + b2_b_ref[...], 0.0)
        delta = jnp.dot(t, b3_w_ref[...], preferred_element_type=f32) + b3_b_ref[...]
        ref_c = jnp.clip(reference, eps, 1.0 - eps)
        inv_ref = jnp.log(ref_c / (1.0 - ref_c))
        bbox = sigmoid(delta + inv_ref)

        # lane-dense packed output: [probs (nc) | bbox (4) | zero pad]
        pad = jnp.zeros((nq, out_width - num_classes - 4), f32)
        out_ref[...] = jnp.concatenate([probs, bbox, pad], axis=-1)

    return kernel


def run_head(params, hs, qe, num_classes, out_width=128):
    nq = hs.shape[0]
    r1 = lambda v: v.reshape(1, -1)
    return pl.pallas_call(
        _make_head_kernel(nq, num_classes, out_width),
        out_shape=jax.ShapeDtypeStruct((nq, out_width), jnp.float32),
    )(hs, qe,
      params["ref_w"], r1(params["ref_b"]),
      params["cls_w"], r1(params["cls_b"]),
      params["box1_w"], r1(params["box1_b"]),
      params["box2_w"], r1(params["box2_b"]),
      params["box3_w"], r1(params["box3_b"]))


# ----------------------------- RTDETR glue (exact per the module) -----------------------------

def position_embedding(feat, temperature=10000.0):
    """Exact port of RTDETR.position_embedding. feat: [B, C, H, W] -> [1, C, H, W]."""
    _, C, H, W = feat.shape
    num_pos_feats = C // 2
    scale = 2 * 3.141592653589793
    y = jnp.arange(1, H + 1, dtype=jnp.float32)
    x = jnp.arange(1, W + 1, dtype=jnp.float32)
    y_embed, x_embed = jnp.meshgrid(y, x, indexing="ij")
    y_embed = (y_embed / (H + 1e-6) * scale)[None, :, :]
    x_embed = (x_embed / (W + 1e-6) * scale)[None, :, :]
    dim_t = jnp.arange(num_pos_feats, dtype=jnp.float32)
    dim_t_ = jnp.floor(dim_t / 2) / num_pos_feats
    dim_t = temperature ** (2 * dim_t_)
    pos_x = x_embed[:, :, :, None] / dim_t
    pos_y = y_embed[:, :, :, None] / dim_t
    pos_x = jnp.stack((jnp.sin(pos_x[:, :, :, 0::2]), jnp.cos(pos_x[:, :, :, 1::2])),
                      axis=4).reshape(1, H, W, -1)
    pos_y = jnp.stack((jnp.sin(pos_y[:, :, :, 0::2]), jnp.cos(pos_y[:, :, :, 1::2])),
                      axis=4).reshape(1, H, W, -1)
    pos = jnp.concatenate((pos_y, pos_x), axis=3).transpose(0, 3, 1, 2)
    return pos


def init_params(key, in_ch, d_model, num_classes, num_queries, num_layers, dff):
    keys = iter(jax.random.split(key, 64))

    def nrm(shape, scale=0.02):
        return scale * jax.random.normal(next(keys), shape, dtype=jnp.float32)

    p = {}
    # synthetic backbone/encoder producing pyramid feats at strides 8 and 16
    p["conv1_w"] = nrm((16, in_ch, 3, 3));        p["conv1_b"] = jnp.zeros((16,), jnp.float32)
    p["conv2_w"] = nrm((d_model, 16, 3, 3));      p["conv2_b"] = jnp.zeros((d_model,), jnp.float32)
    p["conv3_w"] = nrm((d_model, d_model, 3, 3)); p["conv3_b"] = jnp.zeros((d_model,), jnp.float32)
    p["conv4_w"] = nrm((d_model, d_model, 3, 3)); p["conv4_b"] = jnp.zeros((d_model,), jnp.float32)
    # decoder (weights stacked over layers so the whole decoder is one pallas_call)
    p["query_embed"] = nrm((num_queries, d_model), 1.0)
    p["ref_w"] = nrm((d_model, 4)); p["ref_b"] = jnp.zeros((4,), jnp.float32)
    p["sa_w"] = nrm((num_layers, 4, d_model, d_model))          # q,k,v,o
    p["sa_b"] = jnp.zeros((num_layers, 4, d_model), jnp.float32)
    p["ca_w"] = nrm((num_layers, 4, d_model, d_model))
    p["ca_b"] = jnp.zeros((num_layers, 4, d_model), jnp.float32)
    p["ffn1_w"] = nrm((num_layers, d_model, dff))
    p["ffn1_b"] = jnp.zeros((num_layers, 1, dff), jnp.float32)
    p["ffn2_w"] = nrm((num_layers, dff, d_model))
    p["ffn2_b"] = jnp.zeros((num_layers, 1, d_model), jnp.float32)
    p["ln_g"] = jnp.ones((num_layers, 3, d_model), jnp.float32)
    p["ln_b"] = jnp.zeros((num_layers, 3, d_model), jnp.float32)
    # detection head
    p["cls_w"] = nrm((d_model, num_classes)); p["cls_b"] = jnp.zeros((num_classes,), jnp.float32)
    p["box1_w"] = nrm((d_model, d_model));    p["box1_b"] = jnp.zeros((d_model,), jnp.float32)
    p["box2_w"] = nrm((d_model, d_model));    p["box2_b"] = jnp.zeros((d_model,), jnp.float32)
    p["box3_w"] = nrm((d_model, 4));          p["box3_b"] = jnp.zeros((4,), jnp.float32)
    return p


def rtdetr_forward(params, x, num_classes=20, num_queries=8):
    """RTDETR.forward with trainable=False -> inference_single_image(x). x: [1, C, H, W]."""
    B, _, H, W = x.shape

    # --- encoder: pyramid feats (synthetic backbone; conv matmuls in Pallas) ---
    c1 = conv3x3_s2(x, params["conv1_w"], params["conv1_b"])
    c2 = conv3x3_s2(c1, params["conv2_w"], params["conv2_b"])
    c3 = conv3x3_s2(c2, params["conv3_w"], params["conv3_b"])   # stride 8
    c4 = conv3x3_s2(c3, params["conv4_w"], params["conv4_b"])   # stride 16
    pyramid_feats = [c3, c4]

    # --- memory / memory_pos: cat(flatten(2)) then permute(0,2,1), exactly as in the module ---
    memory = jnp.concatenate([f.reshape(B, f.shape[1], -1) for f in pyramid_feats], axis=-1)
    memory_pos = jnp.concatenate(
        [position_embedding(f).reshape(1, f.shape[1], -1) for f in pyramid_feats], axis=-1)
    memory = jnp.transpose(memory, (0, 2, 1))        # [B, S, d_model]
    memory_pos = jnp.transpose(memory_pos, (0, 2, 1))
    mem, mem_pos = memory[0], memory_pos[0]          # single-image inference (B == 1)
    memkv = mem + mem_pos                            # hoisted once, shared by all layers

    # --- decoder: ONE pallas_call, grid over layers (self-attn + cross-attn + FFN fused) ---
    qe = params["query_embed"]
    hs = run_decoder(params, qe, mem, memkv)                     # [nq, d]

    # --- detection head: ONE fused pallas_call, lane-dense [nq, 128] packed output ---
    head_out = run_head(params, hs, qe, num_classes)
    probs = head_out[:, :num_classes]                            # sigmoid class scores
    out_bbox = head_out[:, num_classes:num_classes + 4]          # sigmoid boxes (cxcywh, [0,1])

    # --- post-processing from inference_single_image (exact semantics) ---
    cls_pred = probs.reshape(-1)                                 # flatten().sigmoid_()
    num_topk = 100
    # TODO(synk): descending sort / top-k has no clean Pallas TPU primitive; done in plain JAX.
    order = jnp.argsort(-cls_pred)
    topk_idxs = order[:num_topk]
    topk_scores = cls_pred[topk_idxs]
    topk_box_idxs = topk_idxs // num_classes
    topk_labels = topk_idxs % num_classes
    topk_bboxes = out_bbox[topk_box_idxs]                        # [100, 4]
    scale_vec = jnp.array([W, H, W, H], jnp.float32)             # 0::2 *= W, 1::2 *= H
    topk_bboxes = topk_bboxes * scale_vec
    return topk_bboxes, topk_scores, topk_labels


if __name__ == "__main__":
    key = jax.random.PRNGKey(0)
    kx, kp = jax.random.split(key)

    # cfg-equivalent: stride=[8,16], d_model=32 (width=1.0), num_classes=20, num_queries=8
    num_classes, num_queries, d_model = 20, 8, 32
    x = jax.random.normal(kx, (1, 4, 32, 32), dtype=jnp.float32)   # NCHW single image

    params = init_params(kp, in_ch=4, d_model=d_model, num_classes=num_classes,
                         num_queries=num_queries, num_layers=2, dff=64)

    fwd = jax.jit(partial(rtdetr_forward, num_classes=num_classes, num_queries=num_queries))
    boxes, scores, labels = fwd(params, x)
    jax.block_until_ready((boxes, scores, labels))
    assert boxes.shape == (100, 4) and scores.shape == (100,) and labels.shape == (100,)
    print("KERNEL_OK")
</pallas_src>

<mosaic_0001>
module attributes {stable_mosaic.version = 11 : i64} {
  func.func @kernel(%arg0: i32, %arg1: memref<256x36xbf16, #tpu.memory_space<vmem>>, %arg2: memref<36x128xbf16, #tpu.memory_space<vmem>>, %arg3: memref<1x128xf32, #tpu.memory_space<vmem>>, %arg4: memref<256x128xf32, #tpu.memory_space<vmem>>) attributes {dimension_semantics = [#tpu.dimension_semantics<parallel>], iteration_bounds = array<i64: 1>, scalar_prefetch = 0 : i64, scratch_operands = 0 : i64, tpu.core_type = #tpu.core_type<tc>, window_params = [{transform_indices = @transform_0, window_bounds = array<i64: 256, 36>}, {pipeline_mode = #tpu.pipeline_mode<synchronous>, transform_indices = @transform_1, window_bounds = array<i64: 36, 128>}, {pipeline_mode = #tpu.pipeline_mode<synchronous>, transform_indices = @transform_2, window_bounds = array<i64: 1, 128>}, {transform_indices = @transform_3, window_bounds = array<i64: 256, 128>}]} {
    %c0 = arith.constant 0 : index
    %c0_0 = arith.constant 0 : index
    %0 = vector.load %arg1[%c0, %c0_0] : memref<256x36xbf16, #tpu.memory_space<vmem>>, vector<256x36xbf16>
    %c0_1 = arith.constant 0 : index
    %c0_2 = arith.constant 0 : index
    %1 = vector.load %arg2[%c0_1, %c0_2] : memref<36x128xbf16, #tpu.memory_space<vmem>>, vector<36x128xbf16>
    %cst = arith.constant dense<0.000000e+00> : vector<256x128xf32>
    %2 = tpu.matmul %0, %1, %cst {dimension_numbers = #tpu.dot_dimension_numbers<[1], [0], [0], [1], [0, 0, 1, 1], [], []>} : vector<256x36xbf16>, vector<36x128xbf16>, vector<256x128xf32> -> vector<256x128xf32>
    %c0_3 = arith.constant 0 : index
    %c0_4 = arith.constant 0 : index
    %3 = vector.load %arg3[%c0_3, %c0_4] : memref<1x128xf32, #tpu.memory_space<vmem>>, vector<1x128xf32>
    %4 = vector.broadcast %3 : vector<1x128xf32> to vector<256x128xf32>
    %5 = arith.addf %2, %4 : vector<256x128xf32>
    %cst_5 = arith.constant 0.000000e+00 : f32
    %6 = vector.broadcast %cst_5 : f32 to vector<256x128xf32>
    %7 = arith.maximumf %5, %6 : vector<256x128xf32>
    %c0_6 = arith.constant 0 : index
    %c0_7 = arith.constant 0 : index
    %8 = vector.load %arg4[%c0_6, %c0_7] : memref<256x128xf32, #tpu.memory_space<vmem>>, vector<256x128xf32>
    tpu.vector_store %arg4[%c0_6, %c0_7], %7 {strides = array<i32>} : memref<256x128xf32, #tpu.memory_space<vmem>>, vector<256x128xf32>,
    return
  }
  func.func @transform_0(%arg0: i32) -> (i32, i32) {
    %c0_i32 = arith.constant 0 : i32
    %c0_i32_0 = arith.constant 0 : i32
    return %arg0, %c0_i32 : i32, i32
  }
  func.func @transform_1(%arg0: i32) -> (i32, i32) {
    %c0_i32 = arith.constant 0 : i32
    %c0_i32_0 = arith.constant 0 : i32
    %c0_i32_1 = arith.constant 0 : i32
    return %c0_i32, %c0_i32_0 : i32, i32
  }
  func.func @transform_2(%arg0: i32) -> (i32, i32) {
    %c0_i32 = arith.constant 0 : i32
    %c0_i32_0 = arith.constant 0 : i32
    %c0_i32_1 = arith.constant 0 : i32
    return %c0_i32, %c0_i32_0 : i32, i32
  }
  func.func @transform_3(%arg0: i32) -> (i32, i32) {
    %c0_i32 = arith.constant 0 : i32
    %c0_i32_0 = arith.constant 0 : i32
    return %arg0, %c0_i32 : i32, i32
  }
}

module attributes {stable_mosaic.version = 11 : i64} {
  func.func @kernel(%arg0: i32, %arg1: memref<64x144xbf16, #tpu.memory_space<vmem>>, %arg2: memref<144x128xbf16, #tpu.memory_space<vmem>>, %arg3: memref<1x128xf32, #tpu.memory_space<vmem>>, %arg4: memref<64x128xf32, #tpu.memory_space<vmem>>) attributes {dimension_semantics = [#tpu.dimension_semantics<parallel>], iteration_bounds = array<i64: 1>, scalar_prefetch = 0 : i64, scratch_operands = 0 : i64, tpu.core_type = #tpu.core_type<tc>, window_params = [{transform_indices = @transform_0, window_bounds = array<i64: 64, 144>}, {pipeline_mode = #tpu.pipeline_mode<synchronous>, transform_indices = @transform_1, window_bounds = array<i64: 144, 128>}, {pipeline_mode = #tpu.pipeline_mode<synchronous>, transform_indices = @transform_2, window_bounds = array<i64: 1, 128>}, {transform_indices = @transform_3, window_bounds = array<i64: 64, 128>}]} {
    %c0 = arith.constant 0 : index
    %c0_0 = arith.constant 0 : index
    %0 = vector.load %arg1[%c0, %c0_0] : memref<64x144xbf16, #tpu.memory_space<vmem>>, vector<64x144xbf16>
    %c0_1 = arith.constant 0 : index
    %c0_2 = arith.constant 0 : index
    %1 = vector.load %arg2[%c0_1, %c0_2] : memref<144x128xbf16, #tpu.memory_space<vmem>>, vector<144x128xbf16>
    %cst = arith.constant dense<0.000000e+00> : vector<64x128xf32>
    %2 = tpu.matmul %0, %1, %cst {dimension_numbers = #tpu.dot_dimension_numbers<[1], [0], [0], [1], [0, 0, 1, 1], [], []>} : vector<64x144xbf16>, vector<144x128xbf16>, vector<64x128xf32> -> vector<64x128xf32>
    %c0_3 = arith.constant 0 : index
    %c0_4 = arith.constant 0 : index
    %3 = vector.load %arg3[%c0_3, %c0_4] : memref<1x128xf32, #tpu.memory_space<vmem>>, vector<1x128xf32>
    %4 = vector.broadcast %3 : vector<1x128xf32> to vector<64x128xf32>
    %5 = arith.addf %2, %4 : vector<64x128xf32>
    %cst_5 = arith.constant 0.000000e+00 : f32
    %6 = vector.broadcast %cst_5 : f32 to vector<64x128xf32>
    %7 = arith.maximumf %5, %6 : vector<64x128xf32>
    %c0_6 = arith.constant 0 : index
    %c0_7 = arith.constant 0 : index
    %8 = vector.load %arg4[%c0_6, %c0_7] : memref<64x128xf32, #tpu.memory_space<vmem>>, vector<64x128xf32>
    tpu.vector_store %arg4[%c0_6, %c0_7], %7 {strides = array<i32>} : memref<64x128xf32, #tpu.memory_space<vmem>>, vector<64x128xf32>,
    return
  }
  func.func @transform_0(%arg0: i32) -> (i32, i32) {
    %c0_i32 = arith.constant 0 : i32
    %c0_i32_0 = arith.constant 0 : i32
    return %arg0, %c0_i32 : i32, i32
  }
  func.func @transform_1(%arg0: i32) -> (i32, i32) {
    %c0_i32 = arith.constant 0 : i32
    %c0_i32_0 = arith.constant 0 : i32
    %c0_i32_1 = arith.constant 0 : i32
    return %c0_i32, %c0_i32_0 : i32, i32
  }
  func.func @transform_2(%arg0: i32) -> (i32, i32) {
    %c0_i32 = arith.constant 0 : i32
    %c0_i32_0 = arith.constant 0 : i32
    %c0_i32_1 = arith.constant 0 : i32
    return %c0_i32, %c0_i32_0 : i32, i32
  }
  func.func @transform_3(%arg0: i32) -> (i32, i32) {
    %c0_i32 = arith.constant 0 : i32
    %c0_i32_0 = arith.constant 0 : i32
    return %arg0, %c0_i32 : i32, i32
  }
}

module attributes {stable_mosaic.version = 11 : i64} {
  func.func @kernel(%arg0: i32, %arg1: memref<16x288xbf16, #tpu.memory_space<vmem>>, %arg2: memref<288x128xbf16, #tpu.memory_space<vmem>>, %arg3: memref<1x128xf32, #tpu.memory_space<vmem>>, %arg4: memref<16x128xf32, #tpu.memory_space<vmem>>) attributes {dimension_semantics = [#tpu.dimension_semantics<parallel>], iteration_bounds = array<i64: 1>, scalar_prefetch = 0 : i64, scratch_operands = 0 : i64, tpu.core_type = #tpu.core_type<tc>, window_params = [{transform_indices = @transform_0, window_bounds = array<i64: 16, 288>}, {pipeline_mode = #tpu.pipeline_mode<synchronous>, transform_indices = @transform_1, window_bounds = array<i64: 288, 128>}, {pipeline_mode = #tpu.pipeline_mode<synchronous>, transform_indices = @transform_2, window_bounds = array<i64: 1, 128>}, {transform_indices = @transform_3, window_bounds = array<i64: 16, 128>}]} {
    %c0 = arith.constant 0 : index
    %c0_0 = arith.constant 0 : index
    %0 = vector.load %arg1[%c0, %c0_0] : memref<16x288xbf16, #tpu.memory_space<vmem>>, vector<16x288xbf16>
    %c0_1 = arith.constant 0 : index
    %c0_2 = arith.constant 0 : index
    %1 = vector.load %arg2[%c0_1, %c0_2] : memref<288x128xbf16, #tpu.memory_space<vmem>>, vector<288x128xbf16>
    %cst = arith.constant dense<0.000000e+00> : vector<16x128xf32>
    %2 = tpu.matmul %0, %1, %cst {dimension_numbers = #tpu.dot_dimension_numbers<[1], [0], [0], [1], [0, 0, 1, 1], [], []>} : vector<16x288xbf16>, vector<288x128xbf16>, vector<16x128xf32> -> vector<16x128xf32>
    %c0_3 = arith.constant 0 : index
    %c0_4 = arith.constant 0 : index
    %3 = vector.load %arg3[%c0_3, %c0_4] : memref<1x128xf32, #tpu.memory_space<vmem>>, vector<1x128xf32>
    %4 = vector.broadcast %3 : vector<1x128xf32> to vector<16x128xf32>
    %5 = arith.addf %2, %4 : vector<16x128xf32>
    %cst_5 = arith.constant 0.000000e+00 : f32
    %6 = vector.broadcast %cst_5 : f32 to vector<16x128xf32>
    %7 = arith.maximumf %5, %6 : vector<16x128xf32>
    %c0_6 = arith.constant 0 : index
    %c0_7 = arith.constant 0 : index
    %8 = vector.load %arg4[%c0_6, %c0_7] : memref<16x128xf32, #tpu.memory_space<vmem>>, vector<16x128xf32>
    tpu.vector_store %arg4[%c0_6, %c0_7], %7 {strides = array<i32>} : memref<16x128xf32, #tpu.memory_space<vmem>>, vector<16x128xf32>,
    return
  }
  func.func @transform_0(%arg0: i32) -> (i32, i32) {
    %c0_i32 = arith.constant 0 : i32
    %c0_i32_0 = arith.constant 0 : i32
    return %arg0, %c0_i32 : i32, i32
  }
  func.func @transform_1(%arg0: i32) -> (i32, i32) {
    %c0_i32 = arith.constant 0 : i32
    %c0_i32_0 = arith.constant 0 : i32
    %c0_i32_1 = arith.constant 0 : i32
    return %c0_i32, %c0_i32_0 : i32, i32
  }
  func.func @transform_2(%arg0: i32) -> (i32, i32) {
    %c0_i32 = arith.constant 0 : i32
    %c0_i32_0 = arith.constant 0 : i32
    %c0_i32_1 = arith.constant 0 : i32
    return %c0_i32, %c0_i32_0 : i32, i32
  }
  func.func @transform_3(%arg0: i32) -> (i32, i32) {
    %c0_i32 = arith.constant 0 : i32
    %c0_i32_0 = arith.constant 0 : i32
    return %arg0, %c0_i32 : i32, i32
  }
}

module attributes {stable_mosaic.version = 11 : i64} {
  func.func @kernel(%arg0: i32, %arg1: memref<4x288xbf16, #tpu.memory_space<vmem>>, %arg2: memref<288x128xbf16, #tpu.memory_space<vmem>>, %arg3: memref<1x128xf32, #tpu.memory_space<vmem>>, %arg4: memref<4x128xf32, #tpu.memory_space<vmem>>) attributes {dimension_semantics = [#tpu.dimension_semantics<parallel>], iteration_bounds = array<i64: 1>, scalar_prefetch = 0 : i64, scratch_operands = 0 : i64, tpu.core_type = #tpu.core_type<tc>, window_params = [{transform_indices = @transform_0, window_bounds = array<i64: 4, 288>}, {pipeline_mode = #tpu.pipeline_mode<synchronous>, transform_indices = @transform_1, window_bounds = array<i64: 288, 128>}, {pipeline_mode = #tpu.pipeline_mode<synchronous>, transform_indices = @transform_2, window_bounds = array<i64: 1, 128>}, {transform_indices = @transform_3, window_bounds = array<i64: 4, 128>}]} {
    %c0 = arith.constant 0 : index
    %c0_0 = arith.constant 0 : index
    %0 = vector.load %arg1[%c0, %c0_0] : memref<4x288xbf16, #tpu.memory_space<vmem>>, vector<4x288xbf16>
    %c0_1 = arith.constant 0 : index
    %c0_2 = arith.constant 0 : index
    %1 = vector.load %arg2[%c0_1, %c0_2] : memref<288x128xbf16, #tpu.memory_space<vmem>>, vector<288x128xbf16>
    %cst = arith.constant dense<0.000000e+00> : vector<4x128xf32>
    %2 = tpu.matmul %0, %1, %cst {dimension_numbers = #tpu.dot_dimension_numbers<[1], [0], [0], [1], [0, 0, 1, 1], [], []>} : vector<4x288xbf16>, vector<288x128xbf16>, vector<4x128xf32> -> vector<4x128xf32>
    %c0_3 = arith.constant 0 : index
    %c0_4 = arith.constant 0 : index
    %3 = vector.load %arg3[%c0_3, %c0_4] : memref<1x128xf32, #tpu.memory_space<vmem>>, vector<1x128xf32>
    %4 = vector.broadcast %3 : vector<1x128xf32> to vector<4x128xf32>
    %5 = arith.addf %2, %4 : vector<4x128xf32>
    %cst_5 = arith.constant 0.000000e+00 : f32
    %6 = vector.broadcast %cst_5 : f32 to vector<4x128xf32>
    %7 = arith.maximumf %5, %6 : vector<4x128xf32>
    %c0_6 = arith.constant 0 : index
    %c0_7 = arith.constant 0 : index
    %8 = vector.load %arg4[%c0_6, %c0_7] : memref<4x128xf32, #tpu.memory_space<vmem>>, vector<4x128xf32>
    tpu.vector_store %arg4[%c0_6, %c0_7], %7 {strides = array<i32>} : memref<4x128xf32, #tpu.memory_space<vmem>>, vector<4x128xf32>,
    return
  }
  func.func @transform_0(%arg0: i32) -> (i32, i32) {
    %c0_i32 = arith.constant 0 : i32
    %c0_i32_0 = arith.constant 0 : i32
    return %arg0, %c0_i32 : i32, i32
  }
  func.func @transform_1(%arg0: i32) -> (i32, i32) {
    %c0_i32 = arith.constant 0 : i32
    %c0_i32_0 = arith.constant 0 : i32
    %c0_i32_1 = arith.constant 0 : i32
    return %c0_i32, %c0_i32_0 : i32, i32
  }
  func.func @transform_2(%arg0: i32) -> (i32, i32) {
    %c0_i32 = arith.constant 0 : i32
    %c0_i32_0 = arith.constant 0 : i32
    %c0_i32_1 = arith.constant 0 : i32
    return %c0_i32, %c0_i32_0 : i32, i32
  }
  func.func @transform_3(%arg0: i32) -> (i32, i32) {
    %c0_i32 = arith.constant 0 : i32
    %c0_i32_0 = arith.constant 0 : i32
    return %arg0, %c0_i32 : i32, i32
  }
}

module attributes {stable_mosaic.version = 11 : i64} {
  func.func @kernel(%arg0: memref<8x32xf32, #tpu.memory_space<vmem>>, %arg1: memref<8x32xf32, #tpu.memory_space<vmem>>, %arg2: memref<32x4xf32, #tpu.memory_space<vmem>>, %arg3: memref<1x4xf32, #tpu.memory_space<vmem>>, %arg4: memref<32x20xf32, #tpu.memory_space<vmem>>, %arg5: memref<1x20xf32, #tpu.memory_space<vmem>>, %arg6: memref<32x32xf32, #tpu.memory_space<vmem>>, %arg7: memref<1x32xf32, #tpu.memory_space<vmem>>, %arg8: memref<32x32xf32, #tpu.memory_space<vmem>>, %arg9: memref<1x32xf32, #tpu.memory_space<vmem>>, %arg10: memref<32x4xf32, #tpu.memory_space<vmem>>, %arg11: memref<1x4xf32, #tpu.memory_space<vmem>>, %arg12: memref<8x128xf32, #tpu.memory_space<vmem>>) attributes {dimension_semantics = [], scalar_prefetch = 0 : i64, scratch_operands = 0 : i64, tpu.core_type = #tpu.core_type<tc>} {
    %c0 = arith.constant 0 : index
    %c0_0 = arith.constant 0 : index
    %0 = vector.load %arg0[%c0, %c0_0] : memref<8x32xf32, #tpu.memory_space<vmem>>, vector<8x32xf32>
    %c0_1 = arith.constant 0 : index
    %c0_2 = arith.constant 0 : index
    %1 = vector.load %arg1[%c0_1, %c0_2] : memref<8x32xf32, #tpu.memory_space<vmem>>, vector<8x32xf32>
    %c0_3 = arith.constant 0 : index
    %c0_4 = arith.constant 0 : index
    %2 = vector.load %arg2[%c0_3, %c0_4] : memref<32x4xf32, #tpu.memory_space<vmem>>, vector<32x4xf32>
    %cst = arith.constant dense<0.000000e+00> : vector<8x4xf32>
    %3 = tpu.matmul %1, %2, %cst {dimension_numbers = #tpu.dot_dimension_numbers<[1], [0], [0], [1], [0, 0, 1, 1], [], []>} : vector<8x32xf32>, vector<32x4xf32>, vector<8x4xf32> -> vector<8x4xf32>
    %c0_5 = arith.constant 0 : index
    %c0_6 = arith.constant 0 : index
    %4 = vector.load %arg3[%c0_5, %c0_6] : memref<1x4xf32, #tpu.memory_space<vmem>>, vector<1x4xf32>
    %5 = vector.broadcast %4 : vector<1x4xf32> to vector<8x4xf32>
    %6 = arith.addf %3, %5 : vector<8x4xf32>
    %cst_7 = arith.constant 0.000000e+00 : f32
    %7 = vector.broadcast %cst_7 : f32 to vector<8x4xf32>
    %8 = arith.subf %7, %6 : vector<8x4xf32>
    %9 = math.exp %8 : vector<8x4xf32>
    %cst_8 = arith.constant 1.000000e+00 : f32
    %10 = vector.broadcast %cst_8 : f32 to vector<8x4xf32>
    %11 = arith.addf %10, %9 : vector<8x4xf32>
    %cst_9 = arith.constant 1.000000e+00 : f32
    %12 = vector.broadcast %cst_9 : f32 to vector<8x4xf32>
    %13 = arith.divf %12, %11 : vector<8x4xf32>
    %c0_10 = arith.constant 0 : index
    %c0_11 = arith.constant 0 : index
    %14 = vector.load %arg4[%c0_10, %c0_11] : memref<32x20xf32, #tpu.memory_space<vmem>>, vector<32x20xf32>
    %cst_12 = arith.constant dense<0.000000e+00> : vector<8x20xf32>
    %15 = tpu.matmul %0, %14, %cst_12 {dimension_numbers = #tpu.dot_dimension_numbers<[1], [0], [0], [1], [0, 0, 1, 1], [], []>} : vector<8x32xf32>, vector<32x20xf32>, vector<8x20xf32> -> vector<8x20xf32>
    %c0_13 = arith.constant 0 : index
    %c0_14 = arith.constant 0 : index
    %16 = vector.load %arg5[%c0_13, %c0_14] : memref<1x20xf32, #tpu.memory_space<vmem>>, vector<1x20xf32>
    %17 = vector.broadcast %16 : vector<1x20xf32> to vector<8x20xf32>
    %18 = arith.addf %15, %17 : vector<8x20xf32>
    %cst_15 = arith.constant 0.000000e+00 : f32
    %19 = vector.broadcast %cst_15 : f32 to vector<8x20xf32>
    %20 = arith.subf %19, %18 : vector<8x20xf32>
    %21 = math.exp %20 : vector<8x20xf32>
    %cst_16 = arith.constant 1.000000e+00 : f32
    %22 = vector.broadcast %cst_16 : f32 to vector<8x20xf32>
    %23 = arith.addf %22, %21 : vector<8x20xf32>
    %cst_17 = arith.constant 1.000000e+00 : f32
    %24 = vector.broadcast %cst_17 : f32 to vector<8x20xf32>
    %25 = arith.divf %24, %23 : vector<8x20xf32>
    %c0_18 = arith.constant 0 : index
    %c0_19 = arith.constant 0 : index
    %26 = vector.load %arg6[%c0_18, %c0_19] : memref<32x32xf32, #tpu.memory_space<vmem>>, vector<32x32xf32>
    %cst_20 = arith.constant dense<0.000000e+00> : vector<8x32xf32>
    %27 = tpu.matmul %0, %26, %cst_20 {dimension_numbers = #tpu.dot_dimension_numbers<[1], [0], [0], [1], [0, 0, 1, 1], [], []>} : vector<8x32xf32>, vector<32x32xf32>, vector<8x32xf32> -> vector<8x32xf32>
    %c0_21 = arith.constant 0 : index
    %c0_22 = arith.constant 0 : index
    %28 = vector.load %arg7[%c0_21, %c0_22] : memref<1x32xf32, #tpu.memory_space<vmem>>, vector<1x32xf32>
    %29 = vector.broadcast %28 : vector<1x32xf32> to vector<8x32xf32>
    %30 = arith.addf %27, %29 : vector<8x32xf32>
    %cst_23 = arith.constant 0.000000e+00 : f32
    %31 = vector.broadcast %cst_23 : f32 to vector<8x32xf32>
    %32 = arith.maximumf %30, %31 : vector<8x32xf32>
    %c0_24 = arith.constant 0 : index
    %c0_25 = arith.constant 0 : index
    %33 = vector.load %arg8[%c0_24, %c0_25] : memref<32x32xf32, #tpu.memory_space<vmem>>, vector<32x32xf32>
    %cst_26 = arith.constant dense<0.000000e+00> : vector<8x32xf32>
    %34 = tpu.matmul %32, %33, %cst_26 {dimension_numbers = #tpu.dot_dimension_numbers<[1], [0], [0], [1], [0, 0, 1, 1], [], []>} : vector<8x32xf32>, vector<32x32xf32>, vector<8x32xf32> -> vector<8x32xf32>
    %c0_27 = arith.constant 0 : index
    %c0_28 = arith.constant 0 : index
    %35 = vector.load %arg9[%c0_27, %c0_28] : memref<1x32xf32, #tpu.memory_space<vmem>>, vector<1x32xf32>
    %36 = vector.broadcast %35 : vector<1x32xf32> to vector<8x32xf32>
    %37 = arith.addf %34, %36 : vector<8x32xf32>
    %cst_29 = arith.constant 0.000000e+00 : f32
    %38 = vector.broadcast %cst_29 : f32 to vector<8x32xf32>
    %39 = arith.maximumf %37, %38 : vector<8x32xf32>
    %c0_30 = arith.constant 0 : index
    %c0_31 = arith.constant 0 : index
    %40 = vector.load %arg10[%c0_30, %c0_31] : memref<32x4xf32, #tpu.memory_space<vmem>>, vector<32x4xf32>
    %cst_32 = arith.constant dense<0.000000e+00> : vector<8x4xf32>
    %41 = tpu.matmul %39, %40, %cst_32 {dimension_numbers = #tpu.dot_dimension_numbers<[1], [0], [0], [1], [0, 0, 1, 1], [], []>} : vector<8x32xf32>, vector<32x4xf32>, vector<8x4xf32> -> vector<8x4xf32>
    %c0_33 = arith.constant 0 : index
    %c0_34 = arith.constant 0 : index
    %42 = vector.load %arg11[%c0_33, %c0_34] : memref<1x4xf32, #tpu.memory_space<vmem>>, vector<1x4xf32>
    %43 = vector.broadcast %42 : vector<1x4xf32> to vector<8x4xf32>
    %44 = arith.addf %41, %43 : vector<8x4xf32>
    %cst_35 = arith.constant 9.99999974E-6 : f32
    %cst_36 = arith.constant 0.999989986 : f32
    %45 = vector.broadcast %cst_35 : f32 to vector<8x4xf32>
    %46 = arith.maximumf %45, %13 : vector<8x4xf32>
    %47 = vector.broadcast %cst_36 : f32 to vector<8x4xf32>
    %48 = arith.minimumf %47, %46 : vector<8x4xf32>
    %cst_37 = arith.constant 1.000000e+00 : f32
    %49 = vector.broadcast %cst_37 : f32 to vector<8x4xf32>
    %50 = arith.subf %49, %48 : vector<8x4xf32>
    %51 = arith.divf %48, %50 : vector<8x4xf32>
    %52 = math.log %51 : vector<8x4xf32>
    %53 = arith.addf %44, %52 : vector<8x4xf32>
    %cst_38 = arith.constant 0.000000e+00 : f32
    %54 = vector.broadcast %cst_38 : f32 to vector<8x4xf32>
    %55 = arith.subf %54, %53 : vector<8x4xf32>
    %56 = math.exp %55 : vector<8x4xf32>
    %cst_39 = arith.constant 1.000000e+00 : f32
    %57 = vector.broadcast %cst_39 : f32 to vector<8x4xf32>
    %58 = arith.addf %57, %56 : vector<8x4xf32>
    %cst_40 = arith.constant 1.000000e+00 : f32
    %59 = vector.broadcast %cst_40 : f32 to vector<8x4xf32>
    %60 = arith.divf %59, %58 : vector<8x4xf32>
    %cst_41 = arith.constant 0.000000e+00 : f32
    %61 = vector.broadcast %cst_41 : f32 to vector<8x104xf32>
    %62 = tpu.concatenate %25, %60, %61 in 1 : vector<8x20xf32>, vector<8x4xf32>, vector<8x104xf32> -> vector<8x128xf32>
    %c0_42 = arith.constant 0 : index
    %c0_43 = arith.constant 0 : index
    %63 = vector.load %arg12[%c0_42, %c0_43] : memref<8x128xf32, #tpu.memory_space<vmem>>, vector<8x128xf32>
    tpu.vector_store %arg12[%c0_42, %c0_43], %62 {strides = array<i32>} : memref<8x128xf32, #tpu.memory_space<vmem>>, vector<8x128xf32>,
    return
  }
}

module attributes {stable_mosaic.version = 11 : i64} {
  func.func @kernel(%arg0: i32, %arg1: memref<8x32xf32, #tpu.memory_space<vmem>>, %arg2: memref<20x32xf32, #tpu.memory_space<vmem>>, %arg3: memref<20x32xf32, #tpu.memory_space<vmem>>, %arg4: memref<1x4x32x32xf32, #tpu.memory_space<vmem>>, %arg5: memref<1x4x32xf32, #tpu.memory_space<vmem>>, %arg6: memref<1x4x32x32xf32, #tpu.memory_space<vmem>>, %arg7: memref<1x4x32xf32, #tpu.memory_space<vmem>>, %arg8: memref<1x32x64xf32, #tpu.memory_space<vmem>>, %arg9: memref<1x1x64xf32, #tpu.memory_space<vmem>>, %arg10: memref<1x64x32xf32, #tpu.memory_space<vmem>>, %arg11: memref<1x1x32xf32, #tpu.memory_space<vmem>>, %arg12: memref<1x3x32xf32, #tpu.memory_space<vmem>>, %arg13: memref<1x3x32xf32, #tpu.memory_space<vmem>>, %arg14: memref<8x32xf32, #tpu.memory_space<vmem>>, %arg15: memref<8x32xf32, #tpu.memory_space<vmem>>) attributes {dimension_semantics = [#tpu.dimension_semantics<arbitrary>], iteration_bounds = array<i64: 2>, scalar_prefetch = 0 : i64, scratch_operands = 1 : i64, tpu.core_type = #tpu.core_type<tc>, window_params = [{pipeline_mode = #tpu.pipeline_mode<synchronous>, transform_indices = @transform_0, window_bounds = array<i64: 8, 32>}, {pipeline_mode = #tpu.pipeline_mode<synchronous>, transform_indices = @transform_1, window_bounds = array<i64: 20, 32>}, {pipeline_mode = #tpu.pipeline_mode<synchronous>, transform_indices = @transform_2, window_bounds = array<i64: 20, 32>}, {transform_indices = @transform_3, window_bounds = array<i64: 1, 4, 32, 32>}, {transform_indices = @transform_4, window_bounds = array<i64: 1, 4, 32>}, {transform_indices = @transform_5, window_bounds = array<i64: 1, 4, 32, 32>}, {transform_indices = @transform_6, window_bounds = array<i64: 1, 4, 32>}, {transform_indices = @transform_7, window_bounds = array<i64: 1, 32, 64>}, {transform_indices = @transform_8, window_bounds = array<i64: 1, 1, 64>}, {transform_indices = @transform_9, window_bounds = array<i64: 1, 64, 32>}, {transform_indices = @transform_10, window_bounds = array<i64: 1, 1, 32>}, {transform_indices = @transform_11, window_bounds = array<i64: 1, 3, 32>}, {transform_indices = @transform_12, window_bounds = array<i64: 1, 3, 32>}, {pipeline_mode = #tpu.pipeline_mode<synchronous>, transform_indices = @transform_13, window_bounds = array<i64: 8, 32>}]} {
    %c0_i32 = arith.constant 0 : i32
    %0 = arith.cmpi eq, %arg0, %c0_i32 : i32
    %1 = arith.extui %0 : i1 to i32
    %c0_i32_0 = arith.constant 0 : i32
    %2 = arith.cmpi ne, %1, %c0_i32_0 : i32
    scf.if %2 {
      %cst_130 = arith.constant 0.000000e+00 : f32
      %202 = vector.broadcast %cst_130 : f32 to vector<8x32xf32>
      %c0_131 = arith.constant 0 : index
      %c0_132 = arith.constant 0 : index
      %203 = vector.load %arg15[%c0_131, %c0_132] : memref<8x32xf32, #tpu.memory_space<vmem>>, vector<8x32xf32>
      tpu.vector_store %arg15[%c0_131, %c0_132], %202 {strides = array<i32>} : memref<8x32xf32, #tpu.memory_space<vmem>>, vector<8x32xf32>,
    } else {
    }
    %c0 = arith.constant 0 : index
    %c0_1 = arith.constant 0 : index
    %3 = vector.load %arg15[%c0, %c0_1] : memref<8x32xf32, #tpu.memory_space<vmem>>, vector<8x32xf32>
    %c0_2 = arith.constant 0 : index
    %c0_3 = arith.constant 0 : index
    %4 = vector.load %arg1[%c0_2, %c0_3] : memref<8x32xf32, #tpu.memory_space<vmem>>, vector<8x32xf32>
    %c0_4 = arith.constant 0 : index
    %c0_5 = arith.constant 0 : index
    %5 = vector.load %arg2[%c0_4, %c0_5] : memref<20x32xf32, #tpu.memory_space<vmem>>, vector<20x32xf32>
    %c0_6 = arith.constant 0 : index
    %c0_7 = arith.constant 0 : index
    %6 = vector.load %arg3[%c0_6, %c0_7] : memref<20x32xf32, #tpu.memory_space<vmem>>, vector<20x32xf32>
    %7 = arith.addf %3, %4 : vector<8x32xf32>
    %c0_8 = arith.constant 0 : index
    %c0_9 = arith.constant 0 : index
    %c0_10 = arith.constant 0 : index
    %c0_11 = arith.constant 0 : index
    %8 = vector.load %arg4[%c0_8, %c0_9, %c0_10, %c0_11] : memref<1x4x32x32xf32, #tpu.memory_space<vmem>>, vector<1x1x32x32xf32>
    %9 = vector.shape_cast %8 : vector<1x1x32x32xf32> to vector<32x32xf32>
    %cst = arith.constant dense<0.000000e+00> : vector<8x32xf32>
    %10 = tpu.matmul %7, %9, %cst {dimension_numbers = #tpu.dot_dimension_numbers<[1], [0], [0], [1], [0, 0, 1, 1], [], []>} : vector<8x32xf32>, vector<32x32xf32>, vector<8x32xf32> -> vector<8x32xf32>
    %c0_12 = arith.constant 0 : index
    %c0_13 = arith.constant 0 : index
    %c0_14 = arith.constant 0 : index
    %11 = vector.load %arg5[%c0_12, %c0_13, %c0_14] : memref<1x4x32xf32, #tpu.memory_space<vmem>>, vector<1x1x32xf32>
    %12 = vector.shape_cast %11 : vector<1x1x32xf32> to vector<32xf32>
    %13 = vector.shape_cast %12 : vector<32xf32> to vector<1x32xf32>
    %14 = vector.broadcast %13 : vector<1x32xf32> to vector<8x32xf32>
    %15 = arith.addf %10, %14 : vector<8x32xf32>
    %c0_15 = arith.constant 0 : index
    %c1 = arith.constant 1 : index
    %c0_16 = arith.constant 0 : index
    %c0_17 = arith.constant 0 : index
    %16 = vector.load %arg4[%c0_15, %c1, %c0_16, %c0_17] : memref<1x4x32x32xf32, #tpu.memory_space<vmem>>, vector<1x1x32x32xf32>
    %17 = vector.shape_cast %16 : vector<1x1x32x32xf32> to vector<32x32xf32>
    %cst_18 = arith.constant dense<0.000000e+00> : vector<8x32xf32>
    %18 = tpu.matmul %7, %17, %cst_18 {dimension_numbers = #tpu.dot_dimension_numbers<[1], [0], [0], [1], [0, 0, 1, 1], [], []>} : vector<8x32xf32>, vector<32x32xf32>, vector<8x32xf32> -> vector<8x32xf32>
    %c0_19 = arith.constant 0 : index
    %c1_20 = arith.constant 1 : index
    %c0_21 = arith.constant 0 : index
    %19 = vector.load %arg5[%c0_19, %c1_20, %c0_21] : memref<1x4x32xf32, #tpu.memory_space<vmem>>, vector<1x1x32xf32>
    %20 = vector.shape_cast %19 : vector<1x1x32xf32> to vector<32xf32>
    %21 = vector.shape_cast %20 : vector<32xf32> to vector<1x32xf32>
    %22 = vector.broadcast %21 : vector<1x32xf32> to vector<8x32xf32>
    %23 = arith.addf %18, %22 : vector<8x32xf32>
    %c0_22 = arith.constant 0 : index
    %c2 = arith.constant 2 : index
    %c0_23 = arith.constant 0 : index
    %c0_24 = arith.constant 0 : index
    %24 = vector.load %arg4[%c0_22, %c2, %c0_23, %c0_24] : memref<1x4x32x32xf32, #tpu.memory_space<vmem>>, vector<1x1x32x32xf32>
    %25 = vector.shape_cast %24 : vector<1x1x32x32xf32> to vector<32x32xf32>
    %cst_25 = arith.constant dense<0.000000e+00> : vector<8x32xf32>
    %26 = tpu.matmul %3, %25, %cst_25 {dimension_numbers = #tpu.dot_dimension_numbers<[1], [0], [0], [1], [0, 0, 1, 1], [], []>} : vector<8x32xf32>, vector<32x32xf32>, vector<8x32xf32> -> vector<8x32xf32>
    %c0_26 = arith.constant 0 : index
    %c2_27 = arith.constant 2 : index
    %c0_28 = arith.constant 0 : index
    %27 = vector.load %arg5[%c0_26, %c2_27, %c0_28] : memref<1x4x32xf32, #tpu.memory_space<vmem>>, vector<1x1x32xf32>
    %28 = vector.shape_cast %27 : vector<1x1x32xf32> to vector<32xf32>
    %29 = vector.shape_cast %28 : vector<32xf32> to vector<1x32xf32>
    %30 = vector.broadcast %29 : vector<1x32xf32> to vector<8x32xf32>
    %31 = arith.addf %26, %30 : vector<8x32xf32>
    %cst_29 = arith.constant 0.176776692 : f32
    %32 = vector.broadcast %cst_29 : f32 to vector<8x32xf32>
    %33 = arith.mulf %15, %32 : vector<8x32xf32>
    %cst_30 = arith.constant dense<0.000000e+00> : vector<8x8xf32>
    %34 = tpu.matmul %33, %23, %cst_30 {dimension_numbers = #tpu.dot_dimension_numbers<[1], [1], [0], [0], [0, 0, 1, 0], [], []>} : vector<8x32xf32>, vector<8x32xf32>, vector<8x8xf32> -> vector<8x8xf32>
    %cst_31 = arith.constant dense<0xFF800000> : vector<8xf32>
    %35 = vector.multi_reduction <maximumf>, %34, %cst_31 [1] : vector<8x8xf32> to vector<8xf32>
    %36 = vector.shape_cast %35 : vector<8xf32> to vector<8x1xf32>
    %37 = vector.broadcast %36 : vector<8x1xf32> to vector<8x8xf32>
    %38 = arith.subf %34, %37 : vector<8x8xf32>
    %39 = math.exp %38 : vector<8x8xf32>
    %cst_32 = arith.constant dense<0.000000e+00> : vector<8xf32>
    %40 = vector.multi_reduction <add>, %39, %cst_32 [1] : vector<8x8xf32> to vector<8xf32>
    %41 = vector.shape_cast %40 : vector<8xf32> to vector<8x1xf32>
    %42 = tpu.reciprocal %41 {approx = true} : vector<8x1xf32> -> vector<8x1xf32>
    %43 = vector.broadcast %42 : vector<8x1xf32> to vector<8x8xf32>
    %44 = arith.mulf %39, %43 : vector<8x8xf32>
    %cst_33 = arith.constant dense<0.000000e+00> : vector<8x32xf32>
    %45 = tpu.matmul %44, %31, %cst_33 {dimension_numbers = #tpu.dot_dimension_numbers<[1], [0], [0], [1], [0, 0, 1, 1], [], []>} : vector<8x8xf32>, vector<8x32xf32>, vector<8x32xf32> -> vector<8x32xf32>
    %c0_34 = arith.constant 0 : index
    %c3 = arith.constant 3 : index
    %c0_35 = arith.constant 0 : index
    %c0_36 = arith.constant 0 : index
    %46 = vector.load %arg4[%c0_34, %c3, %c0_35, %c0_36] : memref<1x4x32x32xf32, #tpu.memory_space<vmem>>, vector<1x1x32x32xf32>
    %47 = vector.shape_cast %46 : vector<1x1x32x32xf32> to vector<32x32xf32>
    %cst_37 = arith.constant dense<0.000000e+00> : vector<8x32xf32>
    %48 = tpu.matmul %45, %47, %cst_37 {dimension_numbers = #tpu.dot_dimension_numbers<[1], [0], [0], [1], [0, 0, 1, 1], [], []>} : vector<8x32xf32>, vector<32x32xf32>, vector<8x32xf32> -> vector<8x32xf32>
    %c0_38 = arith.constant 0 : index
    %c3_39 = arith.constant 3 : index
    %c0_40 = arith.constant 0 : index
    %49 = vector.load %arg5[%c0_38, %c3_39, %c0_40] : memref<1x4x32xf32, #tpu.memory_space<vmem>>, vector<1x1x32xf32>
    %50 = vector.shape_cast %49 : vector<1x1x32xf32> to vector<32xf32>
    %51 = vector.shape_cast %50 : vector<32xf32> to vector<1x32xf32>
    %52 = vector.broadcast %51 : vector<1x32xf32> to vector<8x32xf32>
    %53 = arith.addf %48, %52 : vector<8x32xf32>
    %54 = arith.addf %3, %53 : vector<8x32xf32>
    %c0_41 = arith.constant 0 : index
    %c0_42 = arith.constant 0 : index
    %c0_43 = arith.constant 0 : index
    %55 = vector.load %arg12[%c0_41, %c0_42, %c0_43] : memref<1x3x32xf32, #tpu.memory_space<vmem>>, vector<1x1x32xf32>
    %56 = vector.shape_cast %55 : vector<1x1x32xf32> to vector<32xf32>
    %c0_44 = arith.constant 0 : index
    %c0_45 = arith.constant 0 : index
    %c0_46 = arith.constant 0 : index
    %57 = vector.load %arg13[%c0_44, %c0_45, %c0_46] : memref<1x3x32xf32, #tpu.memory_space<vmem>>, vector<1x1x32xf32>
    %58 = vector.shape_cast %57 : vector<1x1x32xf32> to vector<32xf32>
    %cst_47 = arith.constant dense<0.000000e+00> : vector<8xf32>
    %59 = vector.multi_reduction <add>, %54, %cst_47 [1] : vector<8x32xf32> to vector<8xf32>
    %60 = vector.shape_cast %59 : vector<8xf32> to vector<8x1xf32>
    %cst_48 = arith.constant 3.200000e+01 : f32
    %61 = vector.broadcast %cst_48 : f32 to vector<8x1xf32>
    %62 = arith.divf %60, %61 : vector<8x1xf32>
    %63 = vector.broadcast %62 : vector<8x1xf32> to vector<8x32xf32>
    %64 = arith.subf %54, %63 : vector<8x32xf32>
    %65 = arith.mulf %64, %64 : vector<8x32xf32>
    %cst_49 = arith.constant dense<0.000000e+00> : vector<8xf32>
    %66 = vector.multi_reduction <add>, %65, %cst_49 [1] : vector<8x32xf32> to vector<8xf32>
    %67 = vector.shape_cast %66 : vector<8xf32> to vector<8x1xf32>
    %cst_50 = arith.constant 3.200000e+01 : f32
    %68 = vector.broadcast %cst_50 : f32 to vector<8x1xf32>
    %69 = arith.divf %67, %68 : vector<8x1xf32>
    %cst_51 = arith.constant 9.99999974E-6 : f32
    %70 = vector.broadcast %cst_51 : f32 to vector<8x1xf32>
    %71 = arith.addf %69, %70 : vector<8x1xf32>
    %72 = math.rsqrt %71 : vector<8x1xf32>
    %73 = vector.broadcast %72 : vector<8x1xf32> to vector<8x32xf32>
    %74 = arith.mulf %64, %73 : vector<8x32xf32>
    %75 = vector.shape_cast %56 : vector<32xf32> to vector<1x32xf32>
    %76 = vector.broadcast %75 : vector<1x32xf32> to vector<8x32xf32>
    %77 = arith.mulf %74, %76 : vector<8x32xf32>
    %78 = vector.shape_cast %58 : vector<32xf32> to vector<1x32xf32>
    %79 = vector.broadcast %78 : vector<1x32xf32> to vector<8x32xf32>
    %80 = arith.addf %77, %79 : vector<8x32xf32>
    %81 = arith.addf %80, %4 : vector<8x32xf32>
    %c0_52 = arith.constant 0 : index
    %c0_53 = arith.constant 0 : index
    %c0_54 = arith.constant 0 : index
    %c0_55 = arith.constant 0 : index
    %82 = vector.load %arg6[%c0_52, %c0_53, %c0_54, %c0_55] : memref<1x4x32x32xf32, #tpu.memory_space<vmem>>, vector<1x1x32x32xf32>
    %83 = vector.shape_cast %82 : vector<1x1x32x32xf32> to vector<32x32xf32>
    %cst_56 = arith.constant dense<0.000000e+00> : vector<8x32xf32>
    %84 = tpu.matmul %81, %83, %cst_56 {dimension_numbers = #tpu.dot_dimension_numbers<[1], [0], [0], [1], [0, 0, 1, 1], [], []>} : vector<8x32xf32>, vector<32x32xf32>, vector<8x32xf32> -> vector<8x32xf32>
    %c0_57 = arith.constant 0 : index
    %c0_58 = arith.constant 0 : index
    %c0_59 = arith.constant 0 : index
    %85 = vector.load %arg7[%c0_57, %c0_58, %c0_59] : memref<1x4x32xf32, #tpu.memory_space<vmem>>, vector<1x1x32xf32>
    %86 = vector.shape_cast %85 : vector<1x1x32xf32> to vector<32xf32>
    %87 = vector.shape_cast %86 : vector<32xf32> to vector<1x32xf32>
    %88 = vector.broadcast %87 : vector<1x32xf32> to vector<8x32xf32>
    %89 = arith.addf %84, %88 : vector<8x32xf32>
    %c0_60 = arith.constant 0 : index
    %c1_61 = arith.constant 1 : index
    %c0_62 = arith.constant 0 : index
    %c0_63 = arith.constant 0 : index
    %90 = vector.load %arg6[%c0_60, %c1_61, %c0_62, %c0_63] : memref<1x4x32x32xf32, #tpu.memory_space<vmem>>, vector<1x1x32x32xf32>
    %91 = vector.shape_cast %90 : vector<1x1x32x32xf32> to vector<32x32xf32>
    %cst_64 = arith.constant dense<0.000000e+00> : vector<20x32xf32>
    %92 = tpu.matmul %6, %91, %cst_64 {dimension_numbers = #tpu.dot_dimension_numbers<[1], [0], [0], [1], [0, 0, 1, 1], [], []>} : vector<20x32xf32>, vector<32x32xf32>, vector<20x32xf32> -> vector<20x32xf32>
    %c0_65 = arith.constant 0 : index
    %c1_66 = arith.constant 1 : index
    %c0_67 = arith.constant 0 : index
    %93 = vector.load %arg7[%c0_65, %c1_66, %c0_67] : memref<1x4x32xf32, #tpu.memory_space<vmem>>, vector<1x1x32xf32>
    %94 = vector.shape_cast %93 : vector<1x1x32xf32> to vector<32xf32>
    %95 = vector.shape_cast %94 : vector<32xf32> to vector<1x32xf32>
    %96 = vector.broadcast %95 : vector<1x32xf32> to vector<20x32xf32>
    %97 = arith.addf %92, %96 : vector<20x32xf32>
    %c0_68 = arith.constant 0 : index
    %c2_69 = arith.constant 2 : index
    %c0_70 = arith.constant 0 : index
    %c0_71 = arith.constant 0 : index
    %98 = vector.load %arg6[%c0_68, %c2_69, %c0_70, %c0_71] : memref<1x4x32x32xf32, #tpu.memory_space<vmem>>, vector<1x1x32x32xf32>
    %99 = vector.shape_cast %98 : vector<1x1x32x32xf32> to vector<32x32xf32>
    %cst_72 = arith.constant dense<0.000000e+00> : vector<20x32xf32>
    %100 = tpu.matmul %5, %99, %cst_72 {dimension_numbers = #tpu.dot_dimension_numbers<[1], [0], [0], [1], [0, 0, 1, 1], [], []>} : vector<20x32xf32>, vector<32x32xf32>, vector<20x32xf32> -> vector<20x32xf32>
    %c0_73 = arith.constant 0 : index
    %c2_74 = arith.constant 2 : index
    %c0_75 = arith.constant 0 : index
    %101 = vector.load %arg7[%c0_73, %c2_74, %c0_75] : memref<1x4x32xf32, #tpu.memory_space<vmem>>, vector<1x1x32xf32>
    %102 = vector.shape_cast %101 : vector<1x1x32xf32> to vector<32xf32>
    %103 = vector.shape_cast %102 : vector<32xf32> to vector<1x32xf32>
    %104 = vector.broadcast %103 : vector<1x32xf32> to vector<20x32xf32>
    %105 = arith.addf %100, %104 : vector<20x32xf32>
    %cst_76 = arith.constant 0.176776692 : f32
    %106 = vector.broadcast %cst_76 : f32 to vector<8x32xf32>
    %107 = arith.mulf %89, %106 : vector<8x32xf32>
    %cst_77 = arith.constant dense<0.000000e+00> : vector<8x20xf32>
    %108 = tpu.matmul %107, %97, %cst_77 {dimension_numbers = #tpu.dot_dimension_numbers<[1], [1], [0], [0], [0, 0, 1, 0], [], []>} : vector<8x32xf32>, vector<20x32xf32>, vector<8x20xf32> -> vector<8x20xf32>
    %cst_78 = arith.constant dense<0xFF800000> : vector<8xf32>
    %109 = vector.multi_reduction <maximumf>, %108, %cst_78 [1] : vector<8x20xf32> to vector<8xf32>
    %110 = vector.shape_cast %109 : vector<8xf32> to vector<8x1xf32>
    %111 = vector.broadcast %110 : vector<8x1xf32> to vector<8x20xf32>
    %112 = arith.subf %108, %111 : vector<8x20xf32>
    %113 = math.exp %112 : vector<8x20xf32>
    %cst_79 = arith.constant dense<0.000000e+00> : vector<8xf32>
    %114 = vector.multi_reduction <add>, %113, %cst_79 [1] : vector<8x20xf32> to vector<8xf32>
    %115 = vector.shape_cast %114 : vector<8xf32> to vector<8x1xf32>
    %116 = tpu.reciprocal %115 {approx = true} : vector<8x1xf32> -> vector<8x1xf32>
    %117 = vector.broadcast %116 : vector<8x1xf32> to vector<8x20xf32>
    %118 = arith.mulf %113, %117 : vector<8x20xf32>
    %cst_80 = arith.constant dense<0.000000e+00> : vector<8x32xf32>
    %119 = tpu.matmul %118, %105, %cst_80 {dimension_numbers = #tpu.dot_dimension_numbers<[1], [0], [0], [1], [0, 0, 1, 1], [], []>} : vector<8x20xf32>, vector<20x32xf32>, vector<8x32xf32> -> vector<8x32xf32>
    %c0_81 = arith.constant 0 : index
    %c3_82 = arith.constant 3 : index
    %c0_83 = arith.constant 0 : index
    %c0_84 = arith.constant 0 : index
    %120 = vector.load %arg6[%c0_81, %c3_82, %c0_83, %c0_84] : memref<1x4x32x32xf32, #tpu.memory_space<vmem>>, vector<1x1x32x32xf32>
    %121 = vector.shape_cast %120 : vector<1x1x32x32xf32> to vector<32x32xf32>
    %cst_85 = arith.constant dense<0.000000e+00> : vector<8x32xf32>
    %122 = tpu.matmul %119, %121, %cst_85 {dimension_numbers = #tpu.dot_dimension_numbers<[1], [0], [0], [1], [0, 0, 1, 1], [], []>} : vector<8x32xf32>, vector<32x32xf32>, vector<8x32xf32> -> vector<8x32xf32>
    %c0_86 = arith.constant 0 : index
    %c3_87 = arith.constant 3 : index
    %c0_88 = arith.constant 0 : index
    %123 = vector.load %arg7[%c0_86, %c3_87, %c0_88] : memref<1x4x32xf32, #tpu.memory_space<vmem>>, vector<1x1x32xf32>
    %124 = vector.shape_cast %123 : vector<1x1x32xf32> to vector<32xf32>
    %125 = vector.shape_cast %124 : vector<32xf32> to vector<1x32xf32>
    %126 = vector.broadcast %125 : vector<1x32xf32> to vector<8x32xf32>
    %127 = arith.addf %122, %126 : vector<8x32xf32>
    %128 = arith.addf %80, %127 : vector<8x32xf32>
    %c0_89 = arith.constant 0 : index
    %c1_90 = arith.constant 1 : index
    %c0_91 = arith.constant 0 : index
    %129 = vector.load %arg12[%c0_89, %c1_90, %c0_91] : memref<1x3x32xf32, #tpu.memory_space<vmem>>, vector<1x1x32xf32>
    %130 = vector.shape_cast %129 : vector<1x1x32xf32> to vector<32xf32>
    %c0_92 = arith.constant 0 : index
    %c1_93 = arith.constant 1 : index
    %c0_94 = arith.constant 0 : index
    %131 = vector.load %arg13[%c0_92, %c1_93, %c0_94] : memref<1x3x32xf32, #tpu.memory_space<vmem>>, vector<1x1x32xf32>
    %132 = vector.shape_cast %131 : vector<1x1x32xf32> to vector<32xf32>
    %cst_95 = arith.constant dense<0.000000e+00> : vector<8xf32>
    %133 = vector.multi_reduction <add>, %128, %cst_95 [1] : vector<8x32xf32> to vector<8xf32>
    %134 = vector.shape_cast %133 : vector<8xf32> to vector<8x1xf32>
    %cst_96 = arith.constant 3.200000e+01 : f32
    %135 = vector.broadcast %cst_96 : f32 to vector<8x1xf32>
    %136 = arith.divf %134, %135 : vector<8x1xf32>
    %137 = vector.broadcast %136 : vector<8x1xf32> to vector<8x32xf32>
    %138 = arith.subf %128, %137 : vector<8x32xf32>
    %139 = arith.mulf %138, %138 : vector<8x32xf32>
    %cst_97 = arith.constant dense<0.000000e+00> : vector<8xf32>
    %140 = vector.multi_reduction <add>, %139, %cst_97 [1] : vector<8x32xf32> to vector<8xf32>
    %141 = vector.shape_cast %140 : vector<8xf32> to vector<8x1xf32>
    %cst_98 = arith.constant 3.200000e+01 : f32
    %142 = vector.broadcast %cst_98 : f32 to vector<8x1xf32>
    %143 = arith.divf %141, %142 : vector<8x1xf32>
    %cst_99 = arith.constant 9.99999974E-6 : f32
    %144 = vector.broadcast %cst_99 : f32 to vector<8x1xf32>
    %145 = arith.addf %143, %144 : vector<8x1xf32>
    %146 = math.rsqrt %145 : vector<8x1xf32>
    %147 = vector.broadcast %146 : vector<8x1xf32> to vector<8x32xf32>
    %148 = arith.mulf %138, %147 : vector<8x32xf32>
    %149 = vector.shape_cast %130 : vector<32xf32> to vector<1x32xf32>
    %150 = vector.broadcast %149 : vector<1x32xf32> to vector<8x32xf32>
    %151 = arith.mulf %148, %150 : vector<8x32xf32>
    %152 = vector.shape_cast %132 : vector<32xf32> to vector<1x32xf32>
    %153 = vector.broadcast %152 : vector<1x32xf32> to vector<8x32xf32>
    %154 = arith.addf %151, %153 : vector<8x32xf32>
    %c0_100 = arith.constant 0 : index
    %c0_101 = arith.constant 0 : index
    %c0_102 = arith.constant 0 : index
    %155 = vector.load %arg8[%c0_100, %c0_101, %c0_102] : memref<1x32x64xf32, #tpu.memory_space<vmem>>, vector<1x32x64xf32>
    %156 = vector.shape_cast %155 : vector<1x32x64xf32> to vector<32x64xf32>
    %cst_103 = arith.constant dense<0.000000e+00> : vector<8x64xf32>
    %157 = tpu.matmul %154, %156, %cst_103 {dimension_numbers = #tpu.dot_dimension_numbers<[1], [0], [0], [1], [0, 0, 1, 1], [], []>} : vector<8x32xf32>, vector<32x64xf32>, vector<8x64xf32> -> vector<8x64xf32>
    %c0_104 = arith.constant 0 : index
    %c0_105 = arith.constant 0 : index
    %c0_106 = arith.constant 0 : index
    %158 = vector.load %arg9[%c0_104, %c0_105, %c0_106] : memref<1x1x64xf32, #tpu.memory_space<vmem>>, vector<1x1x64xf32>
    %159 = vector.shape_cast %158 : vector<1x1x64xf32> to vector<64xf32>
    %160 = vector.shape_cast %159 : vector<64xf32> to vector<1x64xf32>
    %161 = vector.broadcast %160 : vector<1x64xf32> to vector<8x64xf32>
    %162 = arith.addf %157, %161 : vector<8x64xf32>
    %cst_107 = arith.constant 0.000000e+00 : f32
    %163 = vector.broadcast %cst_107 : f32 to vector<8x64xf32>
    %164 = arith.maximumf %162, %163 : vector<8x64xf32>
    %c0_108 = arith.constant 0 : index
    %c0_109 = arith.constant 0 : index
    %c0_110 = arith.constant 0 : index
    %165 = vector.load %arg10[%c0_108, %c0_109, %c0_110] : memref<1x64x32xf32, #tpu.memory_space<vmem>>, vector<1x64x32xf32>
    %166 = vector.shape_cast %165 : vector<1x64x32xf32> to vector<64x32xf32>
    %cst_111 = arith.constant dense<0.000000e+00> : vector<8x32xf32>
    %167 = tpu.matmul %164, %166, %cst_111 {dimension_numbers = #tpu.dot_dimension_numbers<[1], [0], [0], [1], [0, 0, 1, 1], [], []>} : vector<8x64xf32>, vector<64x32xf32>, vector<8x32xf32> -> vector<8x32xf32>
    %c0_112 = arith.constant 0 : index
    %c0_113 = arith.constant 0 : index
    %c0_114 = arith.constant 0 : index
    %168 = vector.load %arg11[%c0_112, %c0_113, %c0_114] : memref<1x1x32xf32, #tpu.memory_space<vmem>>, vector<1x1x32xf32>
    %169 = vector.shape_cast %168 : vector<1x1x32xf32> to vector<32xf32>
    %170 = vector.shape_cast %169 : vector<32xf32> to vector<1x32xf32>
    %171 = vector.broadcast %170 : vector<1x32xf32> to vector<8x32xf32>
    %172 = arith.addf %167, %171 : vector<8x32xf32>
    %173 = arith.addf %154, %172 : vector<8x32xf32>
    %c0_115 = arith.constant 0 : index
    %c2_116 = arith.constant 2 : index
    %c0_117 = arith.constant 0 : index
    %174 = vector.load %arg12[%c0_115, %c2_116, %c0_117] : memref<1x3x32xf32, #tpu.memory_space<vmem>>, vector<1x1x32xf32>
    %175 = vector.shape_cast %174 : vector<1x1x32xf32> to vector<32xf32>
    %c0_118 = arith.constant 0 : index
    %c2_119 = arith.constant 2 : index
    %c0_120 = arith.constant 0 : index
    %176 = vector.load %arg13[%c0_118, %c2_119, %c0_120] : memref<1x3x32xf32, #tpu.memory_space<vmem>>, vector<1x1x32xf32>
    %177 = vector.shape_cast %176 : vector<1x1x32xf32> to vector<32xf32>
    %cst_121 = arith.constant dense<0.000000e+00> : vector<8xf32>
    %178 = vector.multi_reduction <add>, %173, %cst_121 [1] : vector<8x32xf32> to vector<8xf32>
    %179 = vector.shape_cast %178 : vector<8xf32> to vector<8x1xf32>
    %cst_122 = arith.constant 3.200000e+01 : f32
    %180 = vector.broadcast %cst_122 : f32 to vector<8x1xf32>
    %181 = arith.divf %179, %180 : vector<8x1xf32>
    %182 = vector.broadcast %181 : vector<8x1xf32> to vector<8x32xf32>
    %183 = arith.subf %173, %182 : vector<8x32xf32>
    %184 = arith.mulf %183, %183 : vector<8x32xf32>
    %cst_123 = arith.constant dense<0.000000e+00> : vector<8xf32>
    %185 = vector.multi_reduction <add>, %184, %cst_123 [1] : vector<8x32xf32> to vector<8xf32>
    %186 = vector.shape_cast %185 : vector<8xf32> to vector<8x1xf32>
    %cst_124 = arith.constant 3.200000e+01 : f32
    %187 = vector.broadcast %cst_124 : f32 to vector<8x1xf32>
    %188 = arith.divf %186, %187 : vector<8x1xf32>
    %cst_125 = arith.constant 9.99999974E-6 : f32
    %189 = vector.broadcast %cst_125 : f32 to vector<8x1xf32>
    %190 = arith.addf %188, %189 : vector<8x1xf32>
    %191 = math.rsqrt %190 : vector<8x1xf32>
    %192 = vector.broadcast %191 : vector<8x1xf32> to vector<8x32xf32>
    %193 = arith.mulf %183, %192 : vector<8x32xf32>
    %194 = vector.shape_cast %175 : vector<32xf32> to vector<1x32xf32>
    %195 = vector.broadcast %194 : vector<1x32xf32> to vector<8x32xf32>
    %196 = arith.mulf %193, %195 : vector<8x32xf32>
    %197 = vector.shape_cast %177 : vector<32xf32> to vector<1x32xf32>
    %198 = vector.broadcast %197 : vector<1x32xf32> to vector<8x32xf32>
    %199 = arith.addf %196, %198 : vector<8x32xf32>
    %c0_126 = arith.constant 0 : index
    %c0_127 = arith.constant 0 : index
    %200 = vector.load %arg15[%c0_126, %c0_127] : memref<8x32xf32, #tpu.memory_space<vmem>>, vector<8x32xf32>
    tpu.vector_store %arg15[%c0_126, %c0_127], %199 {strides = array<i32>} : memref<8x32xf32, #tpu.memory_space<vmem>>, vector<8x32xf32>,
    %c0_128 = arith.constant 0 : index
    %c0_129 = arith.constant 0 : index
    %201 = vector.load %arg14[%c0_128, %c0_129] : memref<8x32xf32, #tpu.memory_space<vmem>>, vector<8x32xf32>
    tpu.vector_store %arg14[%c0_128, %c0_129], %199 {strides = array<i32>} : memref<8x32xf32, #tpu.memory_space<vmem>>, vector<8x32xf32>,
    return
  }
  func.func @transform_0(%arg0: i32) -> (i32, i32) {
    %c0_i32 = arith.constant 0 : i32
    %c0_i32_0 = arith.constant 0 : i32
    %c0_i32_1 = arith.constant 0 : i32
    return %c0_i32, %c0_i32_0 : i32, i32
  }
  func.func @transform_1(%arg0: i32) -> (i32, i32) {
    %c0_i32 = arith.constant 0 : i32
    %c0_i32_0 = arith.constant 0 : i32
    %c0_i32_1 = arith.constant 0 : i32
    return %c0_i32, %c0_i32_0 : i32, i32
  }
  func.func @transform_2(%arg0: i32) -> (i32, i32) {
    %c0_i32 = arith.constant 0 : i32
    %c0_i32_0 = arith.constant 0 : i32
    %c0_i32_1 = arith.constant 0 : i32
    return %c0_i32, %c0_i32_0 : i32, i32
  }
  func.func @transform_3(%arg0: i32) -> (i32, i32, i32, i32) {
    %c0_i32 = arith.constant 0 : i32
    %c0_i32_0 = arith.constant 0 : i32
    %c0_i32_1 = arith.constant 0 : i32
    %c0_i32_2 = arith.constant 0 : i32
    return %arg0, %c0_i32, %c0_i32_0, %c0_i32_1 : i32, i32, i32, i32
  }
  func.func @transform_4(%arg0: i32) -> (i32, i32, i32) {
    %c0_i32 = arith.constant 0 : i32
    %c0_i32_0 = arith.constant 0 : i32
    %c0_i32_1 = arith.constant 0 : i32
    return %arg0, %c0_i32, %c0_i32_0 : i32, i32, i32
  }
  func.func @transform_5(%arg0: i32) -> (i32, i32, i32, i32) {
    %c0_i32 = arith.constant 0 : i32
    %c0_i32_0 = arith.constant 0 : i32
    %c0_i32_1 = arith.constant 0 : i32
    %c0_i32_2 = arith.constant 0 : i32
    return %arg0, %c0_i32, %c0_i32_0, %c0_i32_1 : i32, i32, i32, i32
  }
  func.func @transform_6(%arg0: i32) -> (i32, i32, i32) {
    %c0_i32 = arith.constant 0 : i32
    %c0_i32_0 = arith.constant 0 : i32
    %c0_i32_1 = arith.constant 0 : i32
    return %arg0, %c0_i32, %c0_i32_0 : i32, i32, i32
  }
  func.func @transform_7(%arg0: i32) -> (i32, i32, i32) {
    %c0_i32 = arith.constant 0 : i32
    %c0_i32_0 = arith.constant 0 : i32
    %c0_i32_1 = arith.constant 0 : i32
    return %arg0, %c0_i32, %c0_i32_0 : i32, i32, i32
  }
  func.func @transform_8(%arg0: i32) -> (i32, i32, i32) {
    %c0_i32 = arith.constant 0 : i32
    %c0_i32_0 = arith.constant 0 : i32
    %c0_i32_1 = arith.constant 0 : i32
    return %arg0, %c0_i32, %c0_i32_0 : i32, i32, i32
  }
  func.func @transform_9(%arg0: i32) -> (i32, i32, i32) {
    %c0_i32 = arith.constant 0 : i32
    %c0_i32_0 = arith.constant 0 : i32
    %c0_i32_1 = arith.constant 0 : i32
    return %arg0, %c0_i32, %c0_i32_0 : i32, i32, i32
  }
  func.func @transform_10(%arg0: i32) -> (i32, i32, i32) {
    %c0_i32 = arith.constant 0 : i32
    %c0_i32_0 = arith.constant 0 : i32
    %c0_i32_1 = arith.constant 0 : i32
    return %arg0, %c0_i32, %c0_i32_0 : i32, i32, i32
  }
  func.func @transform_11(%arg0: i32) -> (i32, i32, i32) {
    %c0_i32 = arith.constant 0 : i32
    %c0_i32_0 = arith.constant 0 : i32
    %c0_i32_1 = arith.constant 0 : i32
    return %arg0, %c0_i32, %c0_i32_0 : i32, i32, i32
  }
  func.func @transform_12(%arg0: i32) -> (i32, i32, i32) {
    %c0_i32 = arith.constant 0 : i32
    %c0_i32_0 = arith.constant 0 : i32
    %c0_i32_1 = arith.constant 0 : i32
    return %arg0, %c0_i32, %c0_i32_0 : i32, i32, i32
  }
  func.func @transform_13(%arg0: i32) -> (i32, i32) {
    %c0_i32 = arith.constant 0 : i32
    %c0_i32_0 = arith.constant 0 : i32
    %c0_i32_1 = arith.constant 0 : i32
    return %c0_i32, %c0_i32_0 : i32, i32
  }
}

</mosaic_0001>

<bundles_post_ra>
// kernel: rtdetr_forward.6
= control target key start
LH: loop header
LB: loop body
LE: loop exit
PB: predicated region body
PF: predicated region fallthrough
CT: control target
= control target key end

     0   :  { %vm154_vm0 = vcmask 293888   ;;  %vm203_vm1 = vcmask 1041408   ;;  %s782_s1 = inlined_call_operand.vmem [shape: bf16[36,128], index: 1, kind: input, shape index: {}]   ;;  %s783_s0 = inlined_call_operand.vmem [shape: bf16[256,36], index: 0, kind: input, shape index: {}]   ;;  %s784_s2 = inlined_call_operand.vmem [shape: f32[1,128], index: 2, kind: input, shape index: {}]   ;;  %s785_s3 = inlined_call_operand.vmem [shape: f32[256,128], index: 3, kind: output, shape index: {}]  }
   0x1   :  { %v537_v0 = vld [vmem:[%s782_s1] sm:$0xff]   ;;  %v538_v1 = vld [vmem:[%s782_s1 + $0x8] sm:$0xff]   ;;  %v539_v2 = vld [vmem:[%s782_s1 + $0x10] ss:$0 sps:$4 sm:$0x33]  }
   0x2   :  { %491 = vmatprep.subr.bf16.mxu0 %v537_v0  ;;  %529 = vmatprep.subr.bf16.mxu1 %v537_v0  ;;  %v540_v3 = vld [vmem:[%s783_s0] sm:$0xff]   ;;  %v205_v5 = vsel %vm203_vm1, %v539_v2, 0  ;;  %v542_v6 = vld [vmem:[%s783_s0 + $0x8] sm:$0xff]   ;;  %v544_v8 = vld [vmem:[%s783_s0 + $0x10] sm:$0xff]  }
   0x3   :  { %492 = vmatpush3.bf16.msra.mxu0 %v537_v0  ;;  %532 = vmatpush3.bf16.msra.mxu1 %v537_v0  ;;  %v541_v4 = vld [vmem:[%s783_s0 + $0x40] sm:$0xff]   ;;  %v543_v7 = vld [vmem:[%s783_s0 + $0x48] sm:$0xff]   ;;  %v545_v9 = vld [vmem:[%s783_s0 + $0x50] sm:$0xff]  }
   0x4   :  { %493 = vmatprep.subr.bf16.mxu0 %v538_v1  ;;  %530 = vmatprep.subr.bf16.mxu1 %v538_v1  ;;  %v546_v10 = vld [vmem:[%s783_s0 + $0x18] sm:$0xff]   ;;  %v548_v12 = vld [vmem:[%s783_s0 + $0x20] sm:$0xff]   ;;  %v550_v14 = vld [vmem:[%s783_s0 + $0x28] sm:$0xff]  }
   0x5   :  { %497 = vmatprep.mubr.msk.bf16.mxu0 %vm154_vm0, %v540_v3  ;;  %513 = vmatprep.mubr.msk.bf16.mxu1 %vm154_vm0, %v541_v4  ;;  %v547_v11 = vld [vmem:[%s783_s0 + $0x58] sm:$0xff]   ;;  %v549_v13 = vld [vmem:[%s783_s0 + $0x60] sm:$0xff]   ;;  %v551_v15 = vld [vmem:[%s783_s0 + $0x68] sm:$0xff]  }
   0x6   :  { %v552_v16 = vld [vmem:[%s783_s0 + $0x30] sm:$0xff]   ;;  %v554_v18 = vld [vmem:[%s783_s0 + $0x38] sm:$0xff]   ;;  %v652_v20 = vld [vmem:[%s784_s2] ss:$0 sm:$0xff] }
   0x7   :  { %494 = vmatpush3.bf16.msra.mxu0 %v538_v1  ;;  %533 = vmatpush3.bf16.msra.mxu1 %v538_v1  ;;  %v553_v17 = vld [vmem:[%s783_s0 + $0x70] sm:$0xff]   ;;  %v555_v19 = vld [vmem:[%s783_s0 + $0x78] sm:$0xff]  }
   0x8   :  { %535 = vmatprep.subr.msk.bf16.mxu0 %vm203_vm1, %v539_v2  ;;  %536 = vmatprep.subr.msk.bf16.mxu1 %vm203_vm1, %v539_v2 }
   0xb   :  { %496 = vmatpush3.bf16.msra.mxu0 %v205_v5  ;;  %534 = vmatpush3.bf16.msra.mxu1 %v205_v5 }
   0xe   :  { %498 = vmatmul.mubr.msk.bf16.vlgmr.msra.gmra.mrb[0].mxu0 %vm154_vm0, %v542_v6  ;;  %514 = vmatmul.mubr.msk.bf16.vlgmr.msra.gmra.mrb[0].mxu1 %vm154_vm0, %v543_v7 }
   0xf   :  { %501 = vmatprep.mubr.msk.bf16.mxu0 %vm154_vm0, %v544_v8  ;;  %517 = vmatprep.mubr.msk.bf16.mxu1 %vm154_vm0, %v545_v9 }
  0x16   :  { %502 = vmatmul.mubr.msk.bf16.gmra.mrb[4].mxu0 %vm154_vm0, %v546_v10  ;;  %518 = vmatmul.mubr.msk.bf16.gmra.mrb[4].mxu1 %vm154_vm0, %v547_v11 }
  0x17   :  { %505 = vmatprep.mubr.msk.bf16.mxu0 %vm154_vm0, %v548_v12  ;;  %521 = vmatprep.mubr.msk.bf16.mxu1 %vm154_vm0, %v549_v13 }
  0x1e   :  { %506 = vmatmul.mubr.msk.bf16.gmra.mrb[8].mxu0 %vm154_vm0, %v550_v14  ;;  %522 = vmatmul.mubr.msk.bf16.gmra.mrb[8].mxu1 %vm154_vm0, %v551_v15 }
  0x1f   :  { %509 = vmatprep.mubr.msk.bf16.mxu0 %vm154_vm0, %v552_v16  ;;  %525 = vmatprep.mubr.msk.bf16.mxu1 %vm154_vm0, %v553_v17 }
  0x26   :  { %510 = vmatmul.mubr.msk.bf16.gmra.mrb[12].mxu0 %vm154_vm0, %v554_v18  ;;  %526 = vmatmul.mubr.msk.bf16.gmra.mrb[12].mxu1 %vm154_vm0, %v555_v19 }
  0xe1   :  { %v499_v21 = vpop.f32.mrb[0].mxu0  ;;  %v515_v22 = vpop.f32.mrb[0].mxu1 }
  0xe2   :  { %v250_v23 = vadd.f32 %v499_v21, %v652_v20  ;;  %v314_v24 = vadd.f32 %v515_v22, %v652_v20  ;;  %v241_v25 = vpop.f32.mrb[1].mxu0  ;;  %v305_v26 = vpop.f32.mrb[1].mxu1 }
  0xe3   :  { %v242_v27 = vadd.f32 %v652_v20, %v241_v25  ;;  %v306_v28 = vadd.f32 %v652_v20, %v305_v26  ;;  %v500_v29 = vpop.f32.mrb[2].mxu0  ;;  %v516_v30 = vpop.f32.mrb[2].mxu1 }
  0xe4   :  { %v370_v31 = vmax.f32 %v250_v23, 0.0  ;;  %v386_v32 = vmax.f32 %v314_v24, 0.0  ;;  %v253_v33 = vadd.f32 %v500_v29, %v652_v20  ;;  %v317_v34 = vadd.f32 %v516_v30, %v652_v20  ;;  %v244_v35 = vpop.f32.mrb[3].mxu0  ;;  %v308_v36 = vpop.f32.mrb[3].mxu1 }
  0xe5   :  { %v368_v37 = vmax.f32 %v242_v27, 0.0  ;;  %v384_v38 = vmax.f32 %v306_v28, 0.0  ;;  %v245_v39 = vadd.f32 %v652_v20, %v244_v35  ;;  %v309_v40 = vadd.f32 %v652_v20, %v308_v36 }
  0xe6   :  { %402 = vst [vmem:[%s785_s3 + $0x10] sm:$0xff] %v370_v31  ;;  %418 = vst [vmem:[%s785_s3 + $0x90] sm:$0xff] %v386_v32  ;;  %v371_v41 = vmax.f32 %v253_v33, 0.0  ;;  %v387_v42 = vmax.f32 %v317_v34, 0.0 }
  0xe7   :  { %400 = vst [vmem:[%s785_s3] sm:$0xff] %v368_v37  ;;  %416 = vst [vmem:[%s785_s3 + $0x80] sm:$0xff] %v384_v38  ;;  %v369_v43 = vmax.f32 %v245_v39, 0.0  ;;  %v385_v44 = vmax.f32 %v309_v40, 0.0 }
  0xe8   :  { %403 = vst [vmem:[%s785_s3 + $0x18] sm:$0xff] %v371_v41  ;;  %419 = vst [vmem:[%s785_s3 + $0x98] sm:$0xff] %v387_v42 }
  0xe9   :  { %401 = vst [vmem:[%s785_s3 + $0x8] sm:$0xff] %v369_v43  ;;  %417 = vst [vmem:[%s785_s3 + $0x88] sm:$0xff] %v385_v44  ;;  %v503_v45 = vpop.f32.mrb[4].mxu0  ;;  %v519_v46 = vpop.f32.mrb[4].mxu1 }
  0xea   :  { %v266_v47 = vadd.f32 %v503_v45, %v652_v20  ;;  %v330_v48 = vadd.f32 %v519_v46, %v652_v20  ;;  %v257_v49 = vpop.f32.mrb[5].mxu0  ;;  %v321_v50 = vpop.f32.mrb[5].mxu1 }
  0xeb   :  { %v258_v51 = vadd.f32 %v652_v20, %v257_v49  ;;  %v322_v52 = vadd.f32 %v652_v20, %v321_v50  ;;  %v504_v53 = vpop.f32.mrb[6].mxu0  ;;  %v520_v54 = vpop.f32.mrb[6].mxu1 }
  0xec   :  { %v374_v55 = vmax.f32 %v266_v47, 0.0  ;;  %v390_v56 = vmax.f32 %v330_v48, 0.0  ;;  %v269_v57 = vadd.f32 %v504_v53, %v652_v20  ;;  %v333_v58 = vadd.f32 %v520_v54, %v652_v20  ;;  %v260_v59 = vpop.f32.mrb[7].mxu0  ;;  %v324_v60 = vpop.f32.mrb[7].mxu1 }
  0xed   :  { %v372_v61 = vmax.f32 %v258_v51, 0.0  ;;  %v388_v62 = vmax.f32 %v322_v52, 0.0  ;;  %v261_v63 = vadd.f32 %v652_v20, %v260_v59  ;;  %v325_v0 = vadd.f32 %v652_v20, %v324_v60 }
  0xee   :  { %406 = vst [vmem:[%s785_s3 + $0x30] sm:$0xff] %v374_v55  ;;  %422 = vst [vmem:[%s785_s3 + $0xb0] sm:$0xff] %v390_v56  ;;  %v375_v1 = vmax.f32 %v269_v57, 0.0  ;;  %v391_v2 = vmax.f32 %v333_v58, 0.0 }
  0xef   :  { %404 = vst [vmem:[%s785_s3 + $0x20] sm:$0xff] %v372_v61  ;;  %420 = vst [vmem:[%s785_s3 + $0xa0] sm:$0xff] %v388_v62  ;;  %v373_v3 = vmax.f32 %v261_v63, 0.0  ;;  %v389_v4 = vmax.f32 %v325_v0, 0.0 }
  0xf0   :  { %407 = vst [vmem:[%s785_s3 + $0x38] sm:$0xff] %v375_v1  ;;  %423 = vst [vmem:[%s785_s3 + $0xb8] sm:$0xff] %v391_v2 }
  0xf1   :  { %405 = vst [vmem:[%s785_s3 + $0x28] sm:$0xff] %v373_v3  ;;  %421 = vst [vmem:[%s785_s3 + $0xa8] sm:$0xff] %v389_v4  ;;  %v507_v5 = vpop.f32.mrb[8].mxu0  ;;  %v523_v6 = vpop.f32.mrb[8].mxu1 }
  0xf2   :  { %v282_v7 = vadd.f32 %v507_v5, %v652_v20  ;;  %v346_v8 = vadd.f32 %v523_v6, %v652_v20  ;;  %v273_v9 = vpop.f32.mrb[9].mxu0  ;;  %v337_v10 = vpop.f32.mrb[9].mxu1 }
  0xf3   :  { %v274_v11 = vadd.f32 %v652_v20, %v273_v9  ;;  %v338_v12 = vadd.f32 %v652_v20, %v337_v10  ;;  %v508_v13 = vpop.f32.mrb[10].mxu0  ;;  %v524_v14 = vpop.f32.mrb[10].mxu1 }
  0xf4   :  { %v378_v15 = vmax.f32 %v282_v7, 0.0  ;;  %v394_v16 = vmax.f32 %v346_v8, 0.0  ;;  %v285_v17 = vadd.f32 %v508_v13, %v652_v20  ;;  %v349_v18 = vadd.f32 %v524_v14, %v652_v20  ;;  %v276_v19 = vpop.f32.mrb[11].mxu0  ;;  %v340_v21 = vpop.f32.mrb[11].mxu1 }
  0xf5   :  { %v376_v22 = vmax.f32 %v274_v11, 0.0  ;;  %v392_v23 = vmax.f32 %v338_v12, 0.0  ;;  %v277_v24 = vadd.f32 %v652_v20, %v276_v19  ;;  %v341_v25 = vadd.f32 %v652_v20, %v340_v21 }
  0xf6   :  { %410 = vst [vmem:[%s785_s3 + $0x50] sm:$0xff] %v378_v15  ;;  %426 = vst [vmem:[%s785_s3 + $0xd0] sm:$0xff] %v394_v16  ;;  %v379_v26 = vmax.f32 %v285_v17, 0.0  ;;  %v395_v27 = vmax.f32 %v349_v18, 0.0 }
  0xf7   :  { %408 = vst [vmem:[%s785_s3 + $0x40] sm:$0xff] %v376_v22  ;;  %424 = vst [vmem:[%s785_s3 + $0xc0] sm:$0xff] %v392_v23  ;;  %v377_v28 = vmax.f32 %v277_v24, 0.0  ;;  %v393_v29 = vmax.f32 %v341_v25, 0.0 }
  0xf8   :  { %411 = vst [vmem:[%s785_s3 + $0x58] sm:$0xff] %v379_v26  ;;  %427 = vst [vmem:[%s785_s3 + $0xd8] sm:$0xff] %v395_v27 }
  0xf9   :  { %409 = vst [vmem:[%s785_s3 + $0x48] sm:$0xff] %v377_v28  ;;  %425 = vst [vmem:[%s785_s3 + $0xc8] sm:$0xff] %v393_v29  ;;  %v511_v30 = vpop.f32.mrb[12].mxu0  ;;  %v527_v31 = vpop.f32.mrb[12].mxu1 }
  0xfa   :  { %v298_v32 = vadd.f32 %v511_v30, %v652_v20  ;;  %v362_v33 = vadd.f32 %v527_v31, %v652_v20  ;;  %v289_v34 = vpop.f32.mrb[13].mxu0  ;;  %v353_v35 = vpop.f32.mrb[13].mxu1 }
  0xfb   :  { %v290_v36 = vadd.f32 %v652_v20, %v289_v34  ;;  %v354_v37 = vadd.f32 %v652_v20, %v353_v35  ;;  %v512_v38 = vpop.f32.mrb[14].mxu0  ;;  %v528_v39 = vpop.f32.mrb[14].mxu1 }
  0xfc   :  { %v382_v40 = vmax.f32 %v298_v32, 0.0  ;;  %v398_v41 = vmax.f32 %v362_v33, 0.0  ;;  %v301_v42 = vadd.f32 %v512_v38, %v652_v20  ;;  %v365_v43 = vadd.f32 %v528_v39, %v652_v20  ;;  %v292_v44 = vpop.f32.mrb[15].mxu0  ;;  %v356_v45 = vpop.f32.mrb[15].mxu1 }
  0xfd   :  { %v380_v46 = vmax.f32 %v290_v36, 0.0  ;;  %v396_v47 = vmax.f32 %v354_v37, 0.0  ;;  %v293_v48 = vadd.f32 %v652_v20, %v292_v44  ;;  %v357_v49 = vadd.f32 %v652_v20, %v356_v45 }
  0xfe   :  { %414 = vst [vmem:[%s785_s3 + $0x70] sm:$0xff] %v382_v40  ;;  %430 = vst [vmem:[%s785_s3 + $0xf0] sm:$0xff] %v398_v41  ;;  %v383_v50 = vmax.f32 %v301_v42, 0.0  ;;  %v399_v51 = vmax.f32 %v365_v43, 0.0 }
  0xff   :  { %412 = vst [vmem:[%s785_s3 + $0x60] sm:$0xff] %v380_v46  ;;  %428 = vst [vmem:[%s785_s3 + $0xe0] sm:$0xff] %v396_v47  ;;  %v381_v52 = vmax.f32 %v293_v48, 0.0  ;;  %v397_v20 = vmax.f32 %v357_v49, 0.0 }
 0x100   :  { %415 = vst [vmem:[%s785_s3 + $0x78] sm:$0xff] %v383_v50  ;;  %431 = vst [vmem:[%s785_s3 + $0xf8] sm:$0xff] %v399_v51 }
 0x101   :  { %413 = vst [vmem:[%s785_s3 + $0x68] sm:$0xff] %v381_v52  ;;  %429 = vst [vmem:[%s785_s3 + $0xe8] sm:$0xff] %v397_v20 }

// kernel: rtdetr_forward.7
= control target key start
LH: loop header
LB: loop body
LE: loop exit
PB: predicated region body
PF: predicated region fallthrough
CT: control target
= control target key end

     0   :  { %v298_v0 = vmov 0   ;;  %vm138_vm0 = vcmask 130048   ;;  %s401_s1 = inlined_call_operand.vmem [shape: bf16[144,128], index: 1, kind: input, shape index: {}]   ;;  %s402_s0 = inlined_call_operand.vmem [shape: bf16[64,144], index: 0, kind: input, shape index: {}]   ;;  %s403_s2 = inlined_call_operand.vmem [shape: f32[1,128], index: 2, kind: input, shape index: {}]   ;;  %s404_s3 = inlined_call_operand.vmem [shape: f32[64,128], index: 3, kind: output, shape index: {}]  }
   0x1   :  { %151 = vmatprep.subr.bf16.mxu0 %v298_v0  ;;  %258 = vmatprep.subr.bf16.mxu1 %v298_v0  ;;  %v277_v1 = vld [vmem:[%s401_s1] sm:$0xff]   ;;  %v278_v2 = vld [vmem:[%s401_s1 + $0x8] sm:$0xff]   ;;  %v279_v3 = vld [vmem:[%s401_s1 + $0x10] sm:$0xff]  }
   0x2   :  { %152 = vmatpush1.bf16.msra.mxu0 %v277_v1  ;;  %267 = vmatpush1.bf16.msra.mxu1 %v277_v1  ;;  %v280_v4 = vld [vmem:[%s401_s1 + $0x18] sm:$0xff]   ;;  %v288_v5 = vld [vmem:[%s402_s0 + $0x4] ss:$8 sps:$4 sm:$0xff]   ;;  %v283_v9 = vld [vmem:[%s401_s1 + $0x30] sm:$0xff]  }
   0x3   :  { %153 = vmatprep.subr.bf16.mxu0 %v298_v0  ;;  %259 = vmatprep.subr.bf16.mxu1 %v298_v0  ;;  %v291_v6 = vld [vmem:[%s402_s0 + $0x24] ss:$8 sps:$4 sm:$0xff]   ;;  %v284_v10 = vld [vmem:[%s401_s1 + $0x38] sm:$0xff]   ;;  %v286_v12 = vld [vmem:[%s402_s0] ss:$8 sps:$4 sm:$0xff]  }
   0x4   :  { %254 = vmatprep.mubr.msk.bf16.mxu0 %vm138_vm0, %v288_v5  ;;  %256 = vmatprep.mubr.msk.bf16.mxu1 %vm138_vm0, %v291_v6  ;;  %v281_v7 = vld [vmem:[%s401_s1 + $0x20] sm:$0xff]   ;;  %v282_v8 = vld [vmem:[%s401_s1 + $0x28] sm:$0xff]   ;;  %v292_v14 = vld [vmem:[%s402_s0 + $0x14] ss:$8 sps:$4 sm:$0xff]  }
   0x5   :  { %v285_v11 = vld [vmem:[%s401_s1 + $0x40] sm:$0xff]   ;;  %v294_v15 = vld [vmem:[%s402_s0 + $0x34] ss:$8 sps:$4 sm:$0xff]   ;;  %v296_v16 = vld [vmem:[%s402_s0 + $0x10] ss:$8 sps:$4 sm:$0xff]  }
   0x6   :  { %154 = vmatpush1.bf16.msra.mxu0 %v278_v2  ;;  %268 = vmatpush1.bf16.msra.mxu1 %v278_v2  ;;  %v289_v13 = vld [vmem:[%s402_s0 + $0x20] ss:$8 sps:$4 sm:$0xff]   ;;  %v297_v17 = vld [vmem:[%s402_s0 + $0x30] ss:$8 sps:$4 sm:$0xff]  }
   0x7   :  { %155 = vmatprep.subr.bf16.mxu0 %v298_v0  ;;  %260 = vmatprep.subr.bf16.mxu1 %v298_v0  ;;  %v236_v18 = vld [vmem:[%s403_s2] ss:$0 sm:$0xff] }
   0xa   :  { %156 = vmatpush1.bf16.msra.mxu0 %v279_v3  ;;  %269 = vmatpush1.bf16.msra.mxu1 %v279_v3 }
   0xb   :  { %157 = vmatprep.subr.bf16.mxu0 %v298_v0  ;;  %261 = vmatprep.subr.bf16.mxu1 %v298_v0 }
   0xe   :  { %158 = vmatpush1.bf16.msra.mxu0 %v280_v4  ;;  %270 = vmatpush1.bf16.msra.mxu1 %v280_v4 }
   0xf   :  { %159 = vmatprep.subr.bf16.mxu0 %v298_v0  ;;  %262 = vmatprep.subr.bf16.mxu1 %v298_v0 }
  0x12   :  { %160 = vmatpush1.bf16.msra.mxu0 %v281_v7  ;;  %271 = vmatpush1.bf16.msra.mxu1 %v281_v7 }
  0x13   :  { %161 = vmatprep.subr.bf16.mxu0 %v298_v0  ;;  %263 = vmatprep.subr.bf16.mxu1 %v298_v0 }
  0x16   :  { %162 = vmatpush1.bf16.msra.mxu0 %v282_v8  ;;  %272 = vmatpush1.bf16.msra.mxu1 %v282_v8 }
  0x17   :  { %163 = vmatprep.subr.bf16.mxu0 %v298_v0  ;;  %264 = vmatprep.subr.bf16.mxu1 %v298_v0 }
  0x1a   :  { %164 = vmatpush1.bf16.msra.mxu0 %v283_v9  ;;  %273 = vmatpush1.bf16.msra.mxu1 %v283_v9 }
  0x1b   :  { %165 = vmatprep.subr.bf16.mxu0 %v298_v0  ;;  %265 = vmatprep.subr.bf16.mxu1 %v298_v0 }
  0x1e   :  { %166 = vmatpush1.bf16.msra.mxu0 %v284_v10  ;;  %274 = vmatpush1.bf16.msra.mxu1 %v284_v10 }
  0x1f   :  { %167 = vmatprep.subr.bf16.mxu0 %v298_v0  ;;  %266 = vmatprep.subr.bf16.mxu1 %v298_v0 }
  0x22   :  { %168 = vmatpush1.bf16.msra.mxu0 %v285_v11  ;;  %275 = vmatpush1.bf16.msra.mxu1 %v285_v11 }
  0x25   :  { %184 = vmatmul.mubr.bf16.vlgmr.msra.gmra.mrb[0].mxu0 %v286_v12  ;;  %200 = vmatmul.mubr.bf16.vlgmr.msra.gmra.mrb[0].mxu1 %v289_v13 }
  0x26   :  { %255 = vmatprep.mubr.msk.bf16.mxu0 %vm138_vm0, %v292_v14  ;;  %257 = vmatprep.mubr.msk.bf16.mxu1 %vm138_vm0, %v294_v15 }
  0x2d   :  { %192 = vmatmul.mubr.bf16.gmra.mrb[4].mxu0 %v296_v16  ;;  %208 = vmatmul.mubr.bf16.gmra.mrb[4].mxu1 %v297_v17 }
  0xf8   :  { %v185_v19 = vpop.f32.mrb[0].mxu0  ;;  %v201_v20 = vpop.f32.mrb[0].mxu1 }
  0xf9   :  { %v186_v21 = vadd.f32 %v236_v18, %v185_v19  ;;  %v202_v22 = vadd.f32 %v236_v18, %v201_v20  ;;  %v187_v23 = vpop.f32.mrb[1].mxu0  ;;  %v203_v24 = vpop.f32.mrb[1].mxu1 }
  0xfa   :  { %v188_v25 = vpop.f32.mrb[2].mxu0  ;;  %v204_v26 = vpop.f32.mrb[2].mxu1 }
  0xfb   :  { %v216_v27 = vmax.f32 %v186_v21, 0.0  ;;  %v220_v28 = vmax.f32 %v202_v22, 0.0  ;;  %v189_v29 = vadd.f32 %v236_v18, %v188_v25  ;;  %v205_v30 = vadd.f32 %v236_v18, %v204_v26  ;;  %v190_v31 = vpop.f32.mrb[3].mxu0  ;;  %v206_v32 = vpop.f32.mrb[3].mxu1 }
  0xfd   :  { %224 = vst [vmem:[%s404_s3] sm:$0xff] %v216_v27  ;;  %228 = vst [vmem:[%s404_s3 + $0x20] sm:$0xff] %v220_v28  ;;  %v217_v33 = vmax.f32 %v189_v29, 0.0  ;;  %v221_v34 = vmax.f32 %v205_v30, 0.0 }
  0xff   :  { %225 = vst [vmem:[%s404_s3 + $0x8] sm:$0xff] %v217_v33  ;;  %229 = vst [vmem:[%s404_s3 + $0x28] sm:$0xff] %v221_v34 }
 0x100   :  { %v193_v35 = vpop.f32.mrb[4].mxu0  ;;  %v209_v36 = vpop.f32.mrb[4].mxu1 }
 0x101   :  { %v194_v37 = vadd.f32 %v236_v18, %v193_v35  ;;  %v210_v38 = vadd.f32 %v236_v18, %v209_v36  ;;  %v195_v39 = vpop.f32.mrb[5].mxu0  ;;  %v211_v40 = vpop.f32.mrb[5].mxu1 }
 0x102   :  { %v196_v41 = vpop.f32.mrb[6].mxu0  ;;  %v212_v42 = vpop.f32.mrb[6].mxu1 }
 0x103   :  { %v218_v43 = vmax.f32 %v194_v37, 0.0  ;;  %v222_v44 = vmax.f32 %v210_v38, 0.0  ;;  %v197_v45 = vadd.f32 %v236_v18, %v196_v41  ;;  %v213_v46 = vadd.f32 %v236_v18, %v212_v42  ;;  %v198_v47 = vpop.f32.mrb[7].mxu0  ;;  %v214_v48 = vpop.f32.mrb[7].mxu1 }
 0x105   :  { %226 = vst [vmem:[%s404_s3 + $0x10] sm:$0xff] %v218_v43  ;;  %230 = vst [vmem:[%s404_s3 + $0x30] sm:$0xff] %v222_v44  ;;  %v219_v49 = vmax.f32 %v197_v45, 0.0  ;;  %v223_v50 = vmax.f32 %v213_v46, 0.0 }
 0x107   :  { %227 = vst [vmem:[%s404_s3 + $0x18] sm:$0xff] %v219_v49  ;;  %231 = vst [vmem:[%s404_s3 + $0x38] sm:$0xff] %v223_v50 }

// kernel: rtdetr_forward.8
= control target key start
LH: loop header
LB: loop body
LE: loop exit
PB: predicated region body
PF: predicated region fallthrough
CT: control target
= control target key end

     0   :  { %v359_v1 = vmov 0.0   ;;  %vm360_vm0 = vmmov 0   ;;  %vm185_vm1 = vcmask 261120   ;;  %s453_s1 = inlined_call_operand.vmem [shape: bf16[288,128], index: 1, kind: input, shape index: {}]   ;;  %s454_s0 = inlined_call_operand.vmem [shape: bf16[16,288], index: 0, kind: input, shape index: {}]   ;;  %s455_s2 = inlined_call_operand.vmem [shape: f32[1,128], index: 2, kind: input, shape index: {}]   ;;  %s456_s3 = inlined_call_operand.vmem [shape: f32[16,128], index: 3, kind: output, shape index: {}]  }
   0x1   :  { %v337_v0 = vld [vmem:[%s453_s1 + $0x40] sm:$0xff]   ;;  %327 = vmatprep.subr.bf16.mxu1 %v359_v1  ;;  %331 = vmatprep.mubr.msk.bf16.mxu1 %vm360_vm0, %v359_v1  ;;  %v339_v3 = vld [vmem:[%s453_s1 + $0x48] sm:$0xff]   ;;  %v341_v5 = vld [vmem:[%s453_s1 + $0x50] sm:$0xff]  }
   0x2   :  { %v338_v2 = vld [vmem:[%s453_s1] sm:$0xff]   ;;  %302 = vmatprep.subr.bf16.mxu0 %v337_v0  ;;  %v340_v4 = vld [vmem:[%s453_s1 + $0x8] sm:$0xff]   ;;  %v342_v6 = vld [vmem:[%s453_s1 + $0x10] sm:$0xff]  }
   0x3   :  { %303 = vmatpush3.bf16.msra.mxu0 %v338_v2  ;;  %v343_v7 = vld [vmem:[%s453_s1 + $0x58] sm:$0xff]   ;;  %v345_v9 = vld [vmem:[%s453_s1 + $0x60] sm:$0xff]   ;;  %v347_v12 = vld [vmem:[%s453_s1 + $0x68] sm:$0xff]  }
   0x4   :  { %304 = vmatprep.subr.bf16.mxu0 %v339_v3  ;;  %v344_v8 = vld [vmem:[%s453_s1 + $0x18] sm:$0xff]   ;;  %v351_v10 = vld [vmem:[%s453_s1 + $0x80] sm:$0xff]   ;;  %v348_v13 = vld [vmem:[%s453_s1 + $0x28] sm:$0xff]  }
   0x5   :  { %v346_v11 = vld [vmem:[%s453_s1 + $0x20] sm:$0xff]   ;;  %328 = vmatpush3.bf16.msra.mxu1 %v351_v10  ;;  %v357_v15 = vld [vmem:[%s453_s1 + $0x88] sm:$0xff]   ;;  %v349_v16 = vld [vmem:[%s453_s1 + $0x70] sm:$0xff]  }
   0x6   :  { %329 = vmatprep.subr.bf16.mxu1 %v359_v1  ;;  %v356_v14 = vld [vmem:[%s454_s0 + $0x4] ss:$12 sps:$4 sm:$0xff]   ;;  %v358_v17 = vld [vmem:[%s454_s0 + $0x8] ss:$12 sps:$4 sm:$0xff]   ;;  %v352_v19 = vld [vmem:[%s453_s1 + $0x78] sm:$0xff]  }
   0x7   :  { %305 = vmatpush3.bf16.msra.mxu0 %v340_v4  ;;  %221 = vmatprep.mubr.bf16.mxu0 %v356_v14  ;;  %v350_v18 = vld [vmem:[%s453_s1 + $0x30] sm:$0xff]   ;;  %v353_v20 = vld [vmem:[%s453_s1 + $0x38] sm:$0xff]   ;;  %v354_v21 = vld [vmem:[%s454_s0] ss:$12 sps:$4 sm:$0xff]  }
   0x8   :  { %306 = vmatprep.subr.bf16.mxu0 %v341_v5  ;;  %v279_v28 = vld [vmem:[%s455_s2] ss:$0 sm:$0xff] }
   0x9   :  { %330 = vmatpush3.bf16.msra.mxu1 %v357_v15 }
   0xb   :  { %307 = vmatpush3.bf16.msra.mxu0 %v342_v6 }
   0xc   :  { %308 = vmatprep.subr.bf16.mxu0 %v343_v7  ;;  %332 = vmatmul.mubr.msk.bf16.vlgmr.msra.gmra.mrb[0].mxu1 %vm185_vm1, %v358_v17 }
   0xf   :  { %309 = vmatpush3.bf16.msra.mxu0 %v344_v8 }
  0x10   :  { %310 = vmatprep.subr.bf16.mxu0 %v345_v9 }
  0x13   :  { %311 = vmatpush3.bf16.msra.mxu0 %v346_v11 }
  0x14   :  { %312 = vmatprep.subr.bf16.mxu0 %v347_v12 }
  0x17   :  { %313 = vmatpush3.bf16.msra.mxu0 %v348_v13 }
  0x18   :  { %314 = vmatprep.subr.bf16.mxu0 %v349_v16 }
  0x1b   :  { %315 = vmatpush3.bf16.msra.mxu0 %v350_v18 }
  0x1c   :  { %316 = vmatprep.subr.bf16.mxu0 %v352_v19 }
  0x1f   :  { %317 = vmatpush3.bf16.msra.mxu0 %v353_v20 }
  0x22   :  { %222 = vmatmul.mubr.bf16.vlgmr.msra.gmra.mrb[0].mxu0 %v354_v21 }
  0xdf   :  { %v264_v22 = vpop.f32.mrb[0].mxu1 }
  0xe0   :  { %v333_v23 = vpop.f32.mrb[1].mxu1 }
  0xe1   :  { %v267_v24 = vpop.f32.mrb[2].mxu1 }
  0xe2   :  { %v334_v25 = vpop.f32.mrb[3].mxu1 }
  0xf5   :  { %v318_v26 = vpop.f32.mrb[0].mxu0 }
  0xf6   :  { %v319_v27 = vpop.f32.mrb[1].mxu0 }
  0xf7   :  { %v320_v29 = vadd.f32 %v319_v27, %v318_v26  ;;  %v321_v30 = vpop.f32.mrb[2].mxu0 }
  0xf8   :  { %v322_v31 = vpop.f32.mrb[3].mxu0 }
  0xf9   :  { %v224_v32 = vadd.f32 %v320_v29, %v279_v28  ;;  %v323_v33 = vadd.f32 %v322_v31, %v321_v30 }
  0xfb   :  { %v265_v34 = vadd.f32 %v264_v22, %v224_v32  ;;  %v227_v35 = vadd.f32 %v323_v33, %v279_v28 }
  0xfd   :  { %v271_v36 = vmax.f32 %v265_v34, 0.0  ;;  %v268_v37 = vadd.f32 %v267_v24, %v227_v35 }
  0xff   :  { %273 = vst [vmem:[%s456_s3] sm:$0xff] %v271_v36  ;;  %v272_v38 = vmax.f32 %v268_v37, 0.0 }
 0x101   :  { %274 = vst [vmem:[%s456_s3 + $0x8] sm:$0xff] %v272_v38 }

// kernel: rtdetr_forward.9
= control target key start
LH: loop header
LB: loop body
LE: loop exit
PB: predicated region body
PF: predicated region fallthrough
CT: control target
= control target key end

     0   :  { %v351_v1 = vmov 0.0   ;;  %vm352_vm0 = vmmov 0   ;;  %v353_v6 = vmov 1983009808   ;;  %v64_v8 = vlaneseq  ;;  %s437_s1 = inlined_call_operand.vmem [shape: bf16[288,128], index: 1, kind: input, shape index: {}]   ;;  %s438_s0 = inlined_call_operand.vmem [shape: bf16[4,288], index: 0, kind: input, shape index: {}]   ;;  %s439_s2 = inlined_call_operand.vmem [shape: f32[1,128], index: 2, kind: input, shape index: {}]   ;;  %s440_s3 = inlined_call_operand.vmem [shape: f32[4,128], index: 3, kind: output, shape index: {}]  }
   0x1   :  { %v332_v0 = vld [vmem:[%s437_s1 + $0x40] sm:$0xff]   ;;  %321 = vmatprep.subr.bf16.mxu1 %v351_v1  ;;  %325 = vmatprep.mubr.msk.bf16.mxu1 %vm352_vm0, %v351_v1  ;;  %v334_v3 = vld [vmem:[%s437_s1 + $0x48] sm:$0xff]   ;;  %v336_v5 = vld [vmem:[%s437_s1 + $0x50] sm:$0xff]   ;;  %v62_v7 = vunpack.c.l.s4 %v353_v6  ;;  %vm186_vm1 = vcmask 261120  }
   0x2   :  { %v333_v2 = vld [vmem:[%s437_s1] sm:$0xff]   ;;  %296 = vmatprep.subr.bf16.mxu0 %v332_v0  ;;  %v335_v4 = vld [vmem:[%s437_s1 + $0x8] sm:$0xff]   ;;  %v337_v9 = vld [vmem:[%s437_s1 + $0x10] sm:$0xff]   ;;  %v65_v12 = vshrl.u32 %v64_v8, 7 }
   0x3   :  { %297 = vmatpush3.bf16.msra.mxu0 %v333_v2  ;;  %v338_v10 = vld [vmem:[%s437_s1 + $0x58] sm:$0xff]   ;;  %v63_v11 = vunpack.c.0.s8 %v62_v7  ;;  %v340_v14 = vld [vmem:[%s437_s1 + $0x60] sm:$0xff]   ;;  %v342_v18 = vld [vmem:[%s437_s1 + $0x68] sm:$0xff]  }
   0x4   :  { %298 = vmatprep.subr.bf16.mxu0 %v334_v3  ;;  %v339_v13 = vld [vmem:[%s437_s1 + $0x18] sm:$0xff]   ;;  %v346_v15 = vld [vmem:[%s437_s1 + $0x80] sm:$0xff]   ;;  %v350_v22 = vld [vmem:[%s437_s1 + $0x88] sm:$0xff]  }
   0x5   :  { %v66_v16 = vsub.s32 %v63_v11, %v65_v12  ;;  %v341_v17 = vld [vmem:[%s437_s1 + $0x20] sm:$0xff]   ;;  %322 = vmatpush3.bf16.msra.mxu1 %v346_v15  ;;  %v343_v23 = vld [vmem:[%s437_s1 + $0x28] sm:$0xff]   ;;  %v344_v24 = vld [vmem:[%s437_s1 + $0x70] sm:$0xff]  }
   0x6   :  { %323 = vmatprep.subr.bf16.mxu1 %v351_v1  ;;  %v15_v19 = vld [vmem:[%s438_s0] sm:$0x3f]  ;;  %v345_v27 = vld [vmem:[%s437_s1 + $0x30] sm:$0xff]   ;;  %v347_v28 = vld [vmem:[%s437_s1 + $0x78] sm:$0xff]  }
   0x7   :  { %299 = vmatpush3.bf16.msra.mxu0 %v335_v4  ;;  %v60_v20 = vcombine.high %v15_v19, %v15_v19  ;;  %v67_v21 = vrot.slane %v15_v19, %v66_v16  ;;  %v348_v29 = vld [vmem:[%s437_s1 + $0x38] sm:$0xff]   ;;  %v276_v36 = vld [vmem:[%s439_s2] ss:$0 sm:$0xff] }
   0x8   :  { %300 = vmatprep.subr.bf16.mxu0 %v336_v5 }
   0x9   :  { %v74_v25 = vrot.slane %v60_v20, %v66_v16  ;;  %v75_v26 = vcombine.high %v67_v21, %v67_v21  ;;  %324 = vmatpush3.bf16.msra.mxu1 %v350_v22 }
   0xb   :  { %301 = vmatpush3.bf16.msra.mxu0 %v337_v9  ;;  %222 = vmatprep.mubr.bf16.mxu0 %v75_v26 }
   0xc   :  { %302 = vmatprep.subr.bf16.mxu0 %v338_v10  ;;  %326 = vmatmul.mubr.msk.bf16.vlgmr.msra.gmra.mrb[0].mxu1 %vm186_vm1, %v74_v25 }
   0xf   :  { %303 = vmatpush3.bf16.msra.mxu0 %v339_v13 }
  0x10   :  { %304 = vmatprep.subr.bf16.mxu0 %v340_v14 }
  0x13   :  { %305 = vmatpush3.bf16.msra.mxu0 %v341_v17 }
  0x14   :  { %306 = vmatprep.subr.bf16.mxu0 %v342_v18 }
  0x17   :  { %307 = vmatpush3.bf16.msra.mxu0 %v343_v23 }
  0x18   :  { %308 = vmatprep.subr.bf16.mxu0 %v344_v24 }
  0x1b   :  { %309 = vmatpush3.bf16.msra.mxu0 %v345_v27 }
  0x1c   :  { %310 = vmatprep.subr.bf16.mxu0 %v347_v28 }
  0x1f   :  { %311 = vmatpush3.bf16.msra.mxu0 %v348_v29 }
  0x22   :  { %223 = vmatmul.mubr.bf16.vlgmr.msra.gmra.mrb[0].mxu0 %v67_v21 }
  0xdf   :  { %v264_v30 = vpop.f32.mrb[0].mxu1 }
  0xe0   :  { %v327_v31 = vpop.f32.mrb[1].mxu1 }
  0xe1   :  { %v267_v32 = vpop.f32.mrb[2].mxu1 }
  0xe2   :  { %v328_v33 = vpop.f32.mrb[3].mxu1 }
  0xf5   :  { %v312_v34 = vpop.f32.mrb[0].mxu0 }
  0xf6   :  { %v313_v35 = vpop.f32.mrb[1].mxu0 }
  0xf7   :  { %v314_v37 = vadd.f32 %v313_v35, %v312_v34  ;;  %v315_v38 = vpop.f32.mrb[2].mxu0 }
  0xf8   :  { %v316_v39 = vpop.f32.mrb[3].mxu0 }
  0xf9   :  { %v225_v40 = vadd.f32 %v314_v37, %v276_v36 }
  0xfb   :  { %v265_v41 = vadd.f32 %v264_v30, %v225_v40 }
  0xfd   :  { %v270_v42 = vmax.f32 %v265_v41, 0.0 }
  0xff   :  { %271 = vst [vmem:[%s440_s3] sm:$0xf] %v270_v42 }

// kernel: neg.1
= control target key start
LH: loop header
LB: loop body
LE: loop exit
PB: predicated region body
PF: predicated region fallthrough
CT: control target
= control target key end

     0   :  { %s24_s0 = inlined_call_operand.vmem [shape: f32[160], index: 0, kind: input, shape index: {}]   ;;  %s25_s1 = inlined_call_operand.vmem [shape: f32[160], index: 1, kind: output, shape index: {}]  }
   0x1   :  { %v2_v0 = vld [vmem:[%s24_s0] sm:$0x3] }
   0x2   :  { %v5_v1 = vxor.u32 2147483648, %v2_v0 }
   0x4   :  { %7 = vst [vmem:[%s25_s1] sm:$0x3] %v5_v1 }

// kernel: rtdetr_forward.11
= control target key start
LH: loop header
LB: loop body
LE: loop exit
PB: predicated region body
PF: predicated region fallthrough
CT: control target
= control target key end

     0   :  { %v642_v0 = vmov 0.0|0.0   ;;  %vm643_vm0 = vmmov 0   ;;  %v644_v4 = vmov 0.0   ;;  %vm54_vm1 = vcmask 261120   ;;  %s815_s2 = inlined_call_operand.vmem [shape: f32[32,4], index: 2, kind: input, shape index: {}]   ;;  %s816_s4 = inlined_call_operand.vmem [shape: f32[32,20], index: 4, kind: input, shape index: {}]   ;;  %s817_s6 = inlined_call_operand.vmem [shape: f32[32,32], index: 6, kind: input, shape index: {}]   ;;  %s818_s1 = inlined_call_operand.vmem [shape: f32[8,32], index: 1, kind: input, shape index: {}]   ;;  %s819_s0 = inlined_call_operand.vmem [shape: f32[8,32], index: 0, kind: input, shape index: {}]   ;;  %s820_s8 = inlined_call_operand.vmem [shape: f32[32,32], index: 8, kind: input, shape index: {}]   ;;  %s821_s10 = inlined_call_operand.vmem [shape: f32[32,4], index: 10, kind: input, shape index: {}]   ;;  %s822_s7 = inlined_call_operand.vmem [shape: f32[1,32], index: 7, kind: input, shape index: {}]   ;;  %s823_s9 = inlined_call_operand.vmem [shape: f32[1,32], index: 9, kind: input, shape index: {}]   ;;  %s824_s3 = inlined_call_operand.vmem [shape: f32[1,4], index: 3, kind: input, shape index: {}]   ;;  %s825_s11 = inlined_call_operand.vmem [shape: f32[1,4], index: 11, kind: input, shape index: {}]   ;;  %s826_s5 = inlined_call_operand.vmem [shape: f32[1,20], index: 5, kind: input, shape index: {}]   ;;  %s827_s12 = inlined_call_operand.vmem [shape: f32[8,128], index: 12, kind: output, shape index: {}]  }
   0x1   :  { %592 = vmatprep.subr.bf16.mxu0 %v642_v0  ;;  %v43_v1 = vld [vmem:[%s815_s2] sm:$0xff]  ;;  %v44_v2 = vld [vmem:[%s815_s2 + $0x8] sm:$0xff]  ;;  %v45_v3 = vld [vmem:[%s815_s2 + $0x10] sm:$0xff]  ;;  %545 = vmatprep.mubr.msk.f32.mxu0 %vm643_vm0, %v644_v4  ;;  %vm493_vm2 = vcmask 162816   ;;  %vm495_vm3 = vcmask 195584  }
   0x2   :  { %v593_v5 = vpack.c.bf16 %v44_v2, %v43_v1  ;;  %v46_v6 = vld [vmem:[%s815_s2 + $0x18] sm:$0xff]  ;;  %598 = vmatprep.subr.bf16.mxu1 %v642_v0  ;;  %556 = vmatprep.mubr.msk.f32.mxu1 %vm643_vm0, %v644_v4  ;;  %v134_v8 = vld [vmem:[%s816_s4] sm:$0xff]  ;;  %v135_v9 = vld [vmem:[%s816_s4 + $0x8] sm:$0xff] }
   0x3   :  { %v596_v7 = vpack.c.bf16 %v46_v6, %v45_v3  ;;  %v224_v10 = vld [vmem:[%s817_s6] sm:$0xff]  ;;  %v225_v11 = vld [vmem:[%s817_s6 + $0x8] sm:$0xff]  ;;  %v599_v12 = vpack.c.bf16 %v135_v9, %v134_v8  ;;  %v226_v15 = vld [vmem:[%s817_s6 + $0x10] sm:$0xff] }
   0x4   :  { %594 = vmatpush3.bf16.msra.mxu0 %v593_v5  ;;  %v42_v13 = vld [vmem:[%s818_s1] sm:$0xff]  ;;  %v605_v14 = vpack.c.bf16 %v225_v11, %v224_v10  ;;  %v227_v16 = vld [vmem:[%s817_s6 + $0x18] sm:$0xff]  ;;  %v136_v19 = vld [vmem:[%s816_s4 + $0x10] sm:$0xff] }
   0x5   :  { %595 = vmatprep.subr.bf16.mxu0 %v642_v0  ;;  %600 = vmatpush3.bf16.msra.mxu1 %v599_v12  ;;  %v608_v17 = vpack.c.bf16 %v227_v16, %v226_v15  ;;  %v41_v18 = vld [vmem:[%s819_s0] sm:$0xff]  ;;  %v137_v20 = vld [vmem:[%s816_s4 + $0x18] sm:$0xff]  ;;  %v307_v23 = vld [vmem:[%s820_s8 + $0x8] sm:$0xff] }
   0x6   :  { %601 = vmatprep.subr.bf16.mxu1 %v642_v0  ;;  %v602_v21 = vpack.c.bf16 %v137_v20, %v136_v19  ;;  %v306_v22 = vld [vmem:[%s820_s8] sm:$0xff]  ;;  %v308_v25 = vld [vmem:[%s820_s8 + $0x10] sm:$0xff]  ;;  %v309_v26 = vld [vmem:[%s820_s8 + $0x18] sm:$0xff] }
   0x7   :  { %v611_v24 = vpack.c.bf16 %v307_v23, %v306_v22  ;;  %v614_v27 = vpack.c.bf16 %v309_v26, %v308_v25  ;;  %v391_v28 = vld [vmem:[%s821_s10] sm:$0xff]  ;;  %v392_v29 = vld [vmem:[%s821_s10 + $0x8] sm:$0xff]  ;;  %v393_v40 = vld [vmem:[%s821_s10 + $0x10] sm:$0xff] }
   0x8   :  { %597 = vmatpush3.bf16.msra.mxu0 %v596_v7  ;;  %v617_v30 = vpack.c.bf16 %v392_v29, %v391_v28  ;;  %v506_v33 = vld [vmem:[%s822_s7] ss:$0 sm:$0xff]  ;;  %v394_v41 = vld [vmem:[%s821_s10 + $0x18] sm:$0xff] }
   0x9   :  { %604 = vmatprep.subr.bf16.mxu0 %v642_v0  ;;  %603 = vmatpush3.bf16.msra.mxu1 %v602_v21  ;;  %v620_v42 = vpack.c.bf16 %v394_v41, %v393_v40  ;;  %v508_v43 = vld [vmem:[%s823_s9] ss:$0 sm:$0xff] }
   0xa   :  { %610 = vmatprep.subr.bf16.mxu1 %v642_v0  ;;  %v502_v48 = vld [vmem:[%s824_s3] ss:$0 sm:$0xff]  ;;  %s645_s3 = smov 20  }
   0xb   :  { %546 = vmatmul.mubr.msk.f32.vlgmr.msra.gmra.mrb[0].mxu0 %vm54_vm1, %v42_v13  ;;  %v510_v61 = vld [vmem:[%s825_s11] ss:$0 sm:$0xff] }
   0xc   :  { %606 = vmatpush3.bf16.msra.mxu0 %v605_v14  ;;  %567 = vmatprep.mubr.msk.f32.mxu0 %vm643_vm0, %v644_v4  ;;  %v504_v8 = vld [vmem:[%s826_s5] ss:$0 sm:$0xff] }
   0xd   :  { %607 = vmatprep.subr.bf16.mxu0 %v642_v0  ;;  %557 = vmatmul.mubr.msk.f32.vlgmr.msra.gmra.mrb[0].mxu1 %vm54_vm1, %v41_v18 }
   0xe   :  { %612 = vmatpush3.bf16.msra.mxu1 %v611_v24  ;;  %578 = vmatprep.mubr.msk.f32.mxu1 %vm643_vm0, %v644_v4 }
   0xf   :  { %613 = vmatprep.subr.bf16.mxu1 %v642_v0 }
  0x10   :  { %609 = vmatpush3.bf16.msra.mxu0 %v608_v17 }
  0x11   :  { %616 = vmatprep.subr.bf16.mxu0 %v642_v0 }
  0x12   :  { %615 = vmatpush3.bf16.msra.mxu1 %v614_v27 }
  0x13   :  { %568 = vmatmul.mubr.msk.f32.vlgmr.msra.gmra.mrb[2].mxu0 %vm54_vm1, %v41_v18 }
  0x14   :  { %589 = vmatprep.mubr.msk.f32.mxu0 %vm643_vm0, %v644_v4  ;;  %618 = vmatpush3.bf16.msra.mxu0 %v617_v30 }
  0x15   :  { %619 = vmatprep.subr.bf16.mxu0 %v642_v0 }
  0x18   :  { %621 = vmatpush3.bf16.msra.mxu0 %v620_v42 }
  0xde   :  { %v124_v31 = vpop.f32.mrb[0].mxu0 }
  0xdf   :  { %v547_v32 = vpop.f32.mrb[1].mxu0  ;;  %v125_v49 = vadd.f32 %v502_v48, %v124_v31 }
  0xe0   :  { %v214_v38 = vpop.f32.mrb[0].mxu1 }
  0xe1   :  { %v558_v39 = vpop.f32.mrb[1].mxu1  ;;  %v128_v50 = vsub.f32 0.0, %v125_v49  ;;  %v215_v9 = vadd.f32 %v504_v8, %v214_v38 }
  0xe3   :  { %v129_v51 = vmul.f32 1.442695, %v128_v50  ;;  %v218_v10 = vsub.f32 0.0, %v215_v9 }
  0xe5   :  { %626 = vpow2.f32 %v129_v51  ;;  %v219_v11 = vmul.f32 1.442695, %v218_v10 }
  0xe6   :  { %v301_v34 = vpop.f32.mrb[2].mxu0 }
  0xe7   :  { %v302_v35 = vadd.f32 %v506_v33, %v301_v34  ;;  %v569_v36 = vpop.f32.mrb[3].mxu0 }
  0xe9   :  { %v305_v37 = vmax.f32 %v302_v35, 0.0 }
  0xeb   :  { %579 = vmatmul.mubr.msk.f32.vlgmr.msra.gmra.mrb[2].mxu1 %vm54_vm1, %v305_v37 }
  0xef   :  { %v627_v52 = vpop.eup %626 }
  0xf0   :  { %v131_v53 = vadd.f32 1.0, %v627_v52 }
  0xf2   :  { %628 = vrcp.f32 %v131_v53 }
  0xfc   :  { %v629_v54 = vpop.eup %628 }
  0xfd   :  { %v475_v55 = vmax.f32 %v629_v54, 1e-05 }
  0xff   :  { %v476_v56 = vmin.f32 %v475_v55, 0.99999 }
 0x101   :  { %v477_v57 = vsub.f32 1.0, %v476_v56 }
 0x103   :  { %630 = vrcp.f32 %v477_v57 }
 0x10d   :  { %v631_v58 = vpop.eup %630 }
 0x10e   :  { %v479_v59 = vmul.f32 %v631_v58, %v476_v56 }
 0x110   :  { %632 = vlog2.f32 %v479_v59 }
 0x11a   :  { %v633_v60 = vpop.eup %632 }
 0x11b   :  { %v481_v0 = vmul.f32 0.6931472, %v633_v60 }
 0x1be   :  { %v386_v44 = vpop.f32.mrb[2].mxu1 }
 0x1bf   :  { %v387_v45 = vadd.f32 %v508_v43, %v386_v44  ;;  %v580_v46 = vpop.f32.mrb[3].mxu1 }
 0x1c1   :  { %v390_v47 = vmax.f32 %v387_v45, 0.0 }
 0x1c3   :  { %590 = vmatmul.mubr.msk.f32.vlgmr.msra.gmra.mrb[4].mxu0 %vm54_vm1, %v390_v47 }
 0x296   :  { %v471_v62 = vpop.f32.mrb[4].mxu0 }
 0x297   :  { %v472_v63 = vadd.f32 %v510_v61, %v471_v62  ;;  %v591_v1 = vpop.f32.mrb[5].mxu0 }
 0x299   :  { %v482_v2 = vadd.f32 %v481_v0, %v472_v63 }
 0x29b   :  { %v483_v3 = vsub.f32 0.0, %v482_v2 }
 0x29d   :  { %v484_v4 = vmul.f32 1.442695, %v483_v3 }
 0x29f   :  { %634 = vpow2.f32 %v484_v4 }
 0x2a9   :  { %v635_v5 = vpop.eup %634 }
 0x2aa   :  { %v486_v6 = vadd.f32 1.0, %v635_v5 }
 0x2ac   :  { %636 = vrcp.f32 %v486_v6 }
 0x2ad   :  { %638 = vpow2.f32 %v219_v11 }
 0x2b6   :  { %v637_v7 = vpop.eup %636 }
 0x2b7   :  { %490 = vrot.lane.b32.xlu0 %v637_v7, %s645_s3  ;;  %v639_v12 = vpop.eup %638 }
 0x2b8   :  { %v221_v13 = vadd.f32 1.0, %v639_v12 }
 0x2ba   :  { %640 = vrcp.f32 %v221_v13 }
 0x2c4   :  { %v641_v14 = vpop.eup %640 }
 0x329   :  { %v491_v15 = vpop.permute.xlu0 %490 }
 0x32a   :  { %v494_v16 = vsel %vm493_vm2, %v641_v14, %v491_v15 }
 0x32b   :  { %v496_v17 = vsel %vm495_vm3, %v494_v16, 0.0 }
 0x32c   :  { %497 = vst [vmem:[%s827_s12] sm:$0xff] %v496_v17 }

// kernel: rtdetr_forward.10
= control target key start
LH: loop header
LB: loop body
LE: loop exit
PB: predicated region body
PF: predicated region fallthrough
CT: control target
= control target key end

     0   :  { %s2504_s25 = smov 0   ;;  %s2771_s0 = inlined_call_operand.vmem [shape: f32[8,32], index: 0, kind: input, shape index: {}]   ;;  %s2772_s1 = inlined_call_operand.vmem [shape: f32[20,32], index: 1, kind: input, shape index: {}]   ;;  %s2773_s2 = inlined_call_operand.vmem [shape: f32[20,32], index: 2, kind: input, shape index: {}]   ;;  %s2774_s3 = inlined_call_operand.vmem [shape: f32[2,4,32,32], index: 3, kind: input, shape index: {}]   ;;  %s2775_s4 = inlined_call_operand.vmem [shape: f32[2,4,32], index: 4, kind: input, shape index: {}]   ;;  %s2776_s5 = inlined_call_operand.vmem [shape: f32[2,4,32,32], index: 5, kind: input, shape index: {}]   ;;  %s2777_s6 = inlined_call_operand.vmem [shape: f32[2,4,32], index: 6, kind: input, shape index: {}]   ;;  %s2778_s7 = inlined_call_operand.vmem [shape: f32[2,32,64], index: 7, kind: input, shape index: {}]   ;;  %s2779_s8 = inlined_call_operand.vmem [shape: f32[2,1,64], index: 8, kind: input, shape index: {}]   ;;  %s2780_s9 = inlined_call_operand.vmem [shape: f32[2,64,32], index: 9, kind: input, shape index: {}]   ;;  %s2781_s10 = inlined_call_operand.vmem [shape: f32[2,1,32], index: 10, kind: input, shape index: {}]   ;;  %s2782_s11 = inlined_call_operand.vmem [shape: f32[2,3,32], index: 11, kind: input, shape index: {}]   ;;  %s2783_s12 = inlined_call_operand.vmem [shape: f32[2,3,32], index: 12, kind: input, shape index: {}]   ;;  %s2784_s13 = inlined_call_operand.vmem [shape: f32[8,32], index: 13, kind: output, shape index: {}]  }
   0x1   :  { %2787 = sst [smem:[#allocation4_spill]] %s2772_s1 }
   0x2   :  { %2788 = sst [smem:[#allocation5_spill]] %s2774_s3 }
   0x3   :  { %2789 = sst [smem:[#allocation6_spill]] %s2775_s4 }
   0x4   :  { %2790 = sst [smem:[#allocation7_spill]] %s2776_s5 }
   0x5   :  { %2791 = sst [smem:[#allocation8_spill]] %s2777_s6 }
   0x6   :  { %2792 = sst [smem:[#allocation9_spill]] %s2784_s13 }
   0x7 LB: > { %2793 = sst [smem:[#allocation3_spill]] %s2428_s25  ;;  %s2009_s26 = sadd.s32 4294967295, %s2428_s25   ;;  %s2428_s25 = sphi %s2504_s25, %s23_s25  }
   0x8   : > { %p2012_p0 = scmp.ge.s32.totalorder %s2428_s25, 1  ;;  %p464_p1 = scmp.lt.s32.totalorder %s2428_s25, 3 }
   0xa   : > { %p465_p2 = pnand %p2012_p0, %p464_p1 }
   0xb   : > { %p540_p3 = scmp.lt.s32.totalorder (!%p465_p2), %s2009_s26, 1  ;;  %s2794_s3 = sld [smem:[#allocation5_spill]] (!%p465_p2) }
   0xc   : > { %468 = sbr.rel (%p465_p2) target bundleno = 3767 (0xeb7), region = 72  ;;  %s2795_s4 = sld [smem:[#allocation6_spill]] (!%p465_p2) }
   0xd   : > { %s2796_s5 = sld [smem:[#allocation7_spill]] (!%p465_p2)  ;;  %s2797_s6 = sld [smem:[#allocation8_spill]] (!%p465_p2) }
   0xe   : > { %p2025_p4 = scmp.ne.s32.totalorder (!%p465_p2), %s2009_s26, 0 }
  0x13   : > { %s2512_s27 = scalar_select %p540_p3, %s2009_s26, 1 }
  0x14   : > { %vm586_vm0 = vcmask (!%p2025_p4), 261120   ;;  %v2430_v0 = vmov (!%p2025_p4), 0.0  }
  0x15   : > { %s2091_s28 = sshll.u32 %s2512_s27, 7  ;;  %s2015_s29 = sshll.u32 %s2512_s27, 2  ;;  %587 = vst.msk [vmem:[#allocation2] sm:$0xff] (!%p2025_p4), %vm586_vm0, %v2430_v0 }
  0x16   : > { %s2519_s15 = scalar_lea.vmem %s2794_s3, %s2091_s28  ;;  %s2524_s18 = scalar_lea.vmem %s2795_s4, %s2015_s29 }
  0x17   : > { %s2529_s21 = scalar_lea.vmem %s2796_s5, %s2091_s28  ;;  %s2534_s24 = scalar_lea.vmem %s2797_s6, %s2015_s29 }
  0x18   : > { %s2093_s25 = sshll.u32 %s2512_s27, 5  ;;  %s2094_s17 = sshll.u32 %s2512_s27, 6 }
  0x19   : > { %s2544_s16 = scalar_lea.vmem %s2778_s7, %s2093_s25  ;;  %s2550_s28 = scalar_lea.vmem %s2780_s9, %s2094_s17 }
  0x1a   : > { %s573_s23 = scalar_lea.vmem %s2781_s10, %s2512_s27  ;;  %s2559_s13 = scalar_lea.vmem %s2782_s11, %s2015_s29 }
  0x1b   : > { %s2564_s1 = scalar_lea.vmem %s2783_s12, %s2015_s29  ;;  %585 = sbr.rel (%p2025_p4) target bundleno = 34 (0x22), region = 76 }
  0x22 PF: > { %v597_v1 = vld [vmem:[%s2519_s15] sm:$0xff]  ;;  %v598_v2 = vld [vmem:[%s2519_s15 + $0x8] sm:$0xff]  ;;  %v599_v3 = vld [vmem:[%s2519_s15 + $0x10] sm:$0xff]  ;;  %v2431_v4 = vmov 0.0|0.0   ;;  %vm2432_vm1 = vmmov 0   ;;  %v2433_v7 = vmov 0.0  }
  0x23   : > { %2323 = vmatprep.subr.bf16.mxu1 %v2431_v4  ;;  %v2324_v5 = vpack.c.bf16 %v598_v2, %v597_v1  ;;  %v600_v6 = vld [vmem:[%s2519_s15 + $0x18] sm:$0xff]  ;;  %2173 = vmatprep.mubr.msk.f32.mxu1 %vm2432_vm1, %v2433_v7  ;;  %v2576_v9 = vld [vmem:[#allocation2] sm:$0xff]  ;;  %v2029_v12 = vld [vmem:[%s2519_s15 + $0x28] sm:$0xff]  ;;  %vm606_vm2 = vcmask 261120   ;;  %vm920_vm3 = vcmask 64512   ;;  %s2798_s17 = sld [smem:[#allocation4_spill]] }
  0x24   : > { %2335 = vmatprep.subr.bf16.mxu0 %v2431_v4  ;;  %2195 = vmatprep.mubr.msk.f32.mxu0 %vm2432_vm1, %v2433_v7  ;;  %v2327_v8 = vpack.c.bf16 %v600_v6, %v599_v3  ;;  %v2581_v10 = vld [vmem:[%s2771_s0] sm:$0xff]  ;;  %v2030_v15 = vld [vmem:[%s2519_s15 + $0x30] sm:$0xff]  ;;  %v2031_v16 = vld [vmem:[%s2519_s15 + $0x38] sm:$0xff]  ;;  %vm1479_vm5 = vcmask 162816   ;;  %vm1494_vm6 = vcmask 1043456   ;;  %vm1777_vm7 = vcmask 523264  }
  0x25   : > { %2325 = vmatpush3.bf16.msra.mxu1 %v2324_v5  ;;  %v2028_v11 = vld [vmem:[%s2519_s15 + $0x20] sm:$0xff]  ;;  %v596_v13 = vadd.f32 %v2581_v10, %v2576_v9  ;;  %v2333_v17 = vpack.c.bf16 %v2031_v16, %v2030_v15  ;;  %v2035_v28 = vld [vmem:[%s2519_s15 + $0x48] sm:$0xff]  ;;  %v2036_v29 = vld [vmem:[%s2519_s15 + $0x50] sm:$0xff] }
  0x26   : > { %2326 = vmatprep.subr.bf16.mxu1 %v2431_v4  ;;  %v2330_v14 = vpack.c.bf16 %v2029_v12, %v2028_v11  ;;  %v2026_v20 = vld [vmem:[%s2524_s18] ss:$0 sm:$0xff]  ;;  %v2032_v21 = vld [vmem:[%s2524_s18 + $0x1] ss:$0 sm:$0xff]  ;;  %v2037_v31 = vld [vmem:[%s2519_s15 + $0x58] sm:$0xff] }
  0x27   : > { %v2034_v27 = vld [vmem:[%s2519_s15 + $0x40] sm:$0xff]  ;;  %v2339_v32 = vpack.c.bf16 %v2037_v31, %v2036_v29  ;;  %v2044_v46 = vld [vmem:[%s2519_s15 + $0x68] sm:$0xff]  ;;  %v2045_v47 = vld [vmem:[%s2519_s15 + $0x70] sm:$0xff] }
  0x28   : > { %v2336_v30 = vpack.c.bf16 %v2035_v28, %v2034_v27  ;;  %v2038_v42 = vld [vmem:[%s2524_s18 + $0x2] ss:$0 sm:$0xff]  ;;  %v2046_v49 = vld [vmem:[%s2519_s15 + $0x78] sm:$0xff]  ;;  %v2047_v56 = vld [vmem:[%s2524_s18 + $0x3] ss:$0 sm:$0xff] }
  0x29   : > { %2328 = vmatpush3.bf16.msra.mxu1 %v2327_v8  ;;  %v2043_v45 = vld [vmem:[%s2519_s15 + $0x60] sm:$0xff]  ;;  %v2345_v50 = vpack.c.bf16 %v2046_v49, %v2045_v47  ;;  %v2054_v63 = vld [vmem:[%s2529_s21 + $0x28] sm:$0xff]  ;;  %v2055_v0 = vld [vmem:[%s2529_s21 + $0x30] sm:$0xff] }
  0x2a   : > { %2329 = vmatprep.subr.bf16.mxu1 %v2431_v4  ;;  %2337 = vmatpush3.bf16.msra.mxu0 %v2336_v30  ;;  %v2342_v48 = vpack.c.bf16 %v2044_v46, %v2043_v45  ;;  %v2053_v62 = vld [vmem:[%s2529_s21 + $0x20] sm:$0xff]  ;;  %v2056_v2 = vld [vmem:[%s2529_s21 + $0x38] sm:$0xff]  ;;  %v1117_v15 = vld [vmem:[%s2529_s21 + $0x8] sm:$0xff] }
  0x2b   : > { %2338 = vmatprep.subr.bf16.mxu0 %v2431_v4  ;;  %v2354_v1 = vpack.c.bf16 %v2054_v63, %v2053_v62  ;;  %v2357_v3 = vpack.c.bf16 %v2056_v2, %v2055_v0  ;;  %v593_v12 = vld [vmem:[%s2773_s2] sm:$0xff]  ;;  %vm2367_vm4 = vmpackc.low %vm606_vm2, %vm606_vm2  ;;  %v2062_v47 = vld [vmem:[%s2529_s21 + $0x48] sm:$0xff] }
  0x2c   : > { %2174 = vmatmul.mubr.msk.f32.vlgmr.msra.gmra.mrb[0].mxu1 %vm606_vm2, %v596_v13  ;;  %v2050_v27 = vld [vmem:[%s2564_s1] ss:$0 sm:$0xff]  ;;  %v2057_v31 = vld [vmem:[%s2534_s24 + $0x1] ss:$0 sm:$0xff] }
  0x2d   : > { %2331 = vmatpush3.bf16.msra.mxu1 %v2330_v14  ;;  %2184 = vmatprep.mubr.msk.f32.mxu1 %vm2432_vm1, %v2433_v7  ;;  %v1116_v14 = vld [vmem:[%s2529_s21] sm:$0xff] }
  0x2e   : > { %2332 = vmatprep.subr.bf16.mxu1 %v2431_v4  ;;  %2340 = vmatpush3.bf16.msra.mxu0 %v2339_v32  ;;  %v2348_v16 = vpack.c.bf16 %v1117_v15, %v1116_v14  ;;  %v2061_v46 = vld [vmem:[%s2529_s21 + $0x40] sm:$0xff]  ;;  %v2076_v14 = vld [vmem:[%s2529_s21 + $0x68] sm:$0xff]  ;;  %v2077_v15 = vld [vmem:[%s2529_s21 + $0x70] sm:$0xff] }
  0x2f   : > { %2341 = vmatprep.subr.bf16.mxu0 %v2431_v4  ;;  %v2360_v49 = vpack.c.bf16 %v2062_v47, %v2061_v46  ;;  %v1767_v46 = vld [vmem:[%s2550_s28 + $0x28] sm:$0xff] }
  0x31   : > { %2334 = vmatpush3.bf16.msra.mxu1 %v2333_v17  ;;  %2196 = vmatmul.mubr.msk.f32.vlgmr.msra.gmra.mrb[0].mxu0 %vm606_vm2, %v2576_v9  ;;  %v595_v17 = vld [vmem:[%s2773_s2 + $0x10] sm:$0xf] }
  0x32   : > { %2198 = vmatprep.subr.mxu1 %v2433_v7  ;;  %2216 = vmatprep.mubr.msk.f32.mxu0 %vm2432_vm1, %v2433_v7 }
  0x33   : > { %2343 = vmatpush3.bf16.msra.mxu0 %v2342_v48  ;;  %v2063_v48 = vld [vmem:[%s2529_s21 + $0x50] sm:$0xff] }
  0x34   : > { %2185 = vmatmul.mubr.msk.f32.vlgmr.msra.gmra.mrb[2].mxu1 %vm606_vm2, %v596_v13  ;;  %2344 = vmatprep.subr.bf16.mxu0 %v2431_v4  ;;  %v594_v13 = vld [vmem:[%s2773_s2 + $0x8] sm:$0xff] }
  0x35   : > { %2200 = vmatprep.mubr.msk.f32.mxu1 %vm2432_vm1, %v2433_v7 }
  0x37   : > { %2346 = vmatpush3.bf16.msra.mxu0 %v2345_v50  ;;  %v2064_v50 = vld [vmem:[%s2529_s21 + $0x58] sm:$0xff] }
  0x38   : > { %2353 = vmatprep.subr.bf16.mxu0 %v2431_v4 }
  0xff   : > { %v676_v18 = vpop.f32.mrb[0].mxu1 }
 0x100   : > { %v2175_v19 = vpop.f32.mrb[1].mxu1  ;;  %v677_v22 = vadd.f32 %v2026_v20, %v676_v18  ;;  %v1118_v18 = vld [vmem:[%s2529_s21 + $0x10] sm:$0xff] }
 0x101   : > { %v1119_v19 = vld [vmem:[%s2529_s21 + $0x18] sm:$0xff] }
 0x102   : > { %v843_v26 = vmul.f32 0.17677669, %v677_v22  ;;  %v2351_v20 = vpack.c.bf16 %v1119_v19, %v1118_v18 }
 0x104   : > { %v839_v41 = vpop.f32.mrb[0].mxu0 }
 0x105   : > { %v2197_v43 = vpop.f32.mrb[1].mxu0  ;;  %v840_v44 = vadd.f32 %v2038_v42, %v839_v41  ;;  %v2051_v41 = vld [vmem:[%s2534_s24] ss:$0 sm:$0xff] }
 0x107   : > { %v756_v23 = vpop.f32.mrb[2].mxu1 }
 0x108   : > { %v757_v24 = vadd.f32 %v2032_v21, %v756_v23  ;;  %v2186_v25 = vpop.f32.mrb[3].mxu1 }
 0x109   : > { %v2049_v25 = vld [vmem:[%s2559_s13] ss:$0 sm:$0xff] }
 0x10a   : > { %2199 = vmatpush3.xpose.msk.msra.mxu1 %vm606_vm2, %v757_v24 }
 0x10b   : > { %2203 = vmatprep.subr.mxu1 %v2433_v7 }
 0x10d   : > { %2201 = vmatmul.mubr.msk.f32.vlgmr.msra.gmra.mrb[4].mxu1 %vm606_vm2, %v843_v26 }
 0x10e   : > { %2205 = vmatprep.mubr.msk.f32.mxu1 %vm2432_vm1, %v2433_v7  ;;  %2204 = vmatpush3.msra.mxu1 %v840_v44 }
 0x10f   : > { %2347 = vmatprep.subr.bf16.mxu1 %v2431_v4 }
 0x1e0   : > { %v916_v33 = vpop.f32.mrb[4].mxu1 }
 0x1e1   : > { %v2202_v34 = vpop.f32.mrb[5].mxu1  ;;  %v921_v35 = vsel %vm920_vm3, %v916_v33, -inf }
 0x1e2   : > { %922 = vmax.xlane.f32.xlu0 %v921_v35 }
 0x26f   : > { %v923_v36 = vpop.xlane.xlu0 %922 }
 0x270   : > { %v924_v37 = vsub.f32 %v916_v33, %v923_v36 }
 0x272   : > { %v925_v38 = vmul.f32 1.442695, %v924_v37 }
 0x274   : > { %2408 = vpow2.f32 %v925_v38 }
 0x27e   : > { %v2409_v39 = vpop.eup %2408 }
 0x27f   : > { %v927_v40 = vsel %vm920_vm3, %v2409_v39, 0.0 }
 0x280   : > { %928 = vadd.xlane.f32.xlu0 %v927_v40 }
 0x30d   : > { %v929_v51 = vpop.xlane.xlu0 %928 }
 0x30e   : > { %2410 = vrcp.f32 %v929_v51  ;;  %v2363_v51 = vpack.c.bf16 %v2064_v50, %v2063_v48 }
 0x318   : > { %v2411_v52 = vpop.eup %2410 }
 0x319   : > { %v931_v53 = vmul.f32 %v2411_v52, %v2409_v39  ;;  %v590_v52 = vld [vmem:[%s2798_s17] sm:$0xff] }
 0x31b   : > { %2206 = vmatmul.mubr.msk.f32.vlgmr.msra.gmra.mrb[6].mxu1 %vm920_vm3, %v931_v53  ;;  %v591_v53 = vld [vmem:[%s2798_s17 + $0x8] sm:$0xff] }
 0x31c   : > { %2227 = vmatprep.mubr.msk.f32.mxu1 %vm2432_vm1, %v2433_v7  ;;  %2349 = vmatpush3.bf16.msra.mxu1 %v2348_v16 }
 0x31d   : > { %2350 = vmatprep.subr.bf16.mxu1 %v2431_v4 }
 0x320   : > { %2352 = vmatpush3.bf16.msra.mxu1 %v2351_v20 }
 0x321   : > { %2359 = vmatprep.subr.bf16.mxu1 %v2431_v4 }
 0x3ee   : > { %v1001_v54 = vpop.f32.mrb[6].mxu1 }
 0x3ef   : > { %v2207_v55 = vpop.f32.mrb[7].mxu1  ;;  %2217 = vmatmul.mubr.msk.f32.vlgmr.msra.gmra.mrb[2].mxu0 %vm606_vm2, %v1001_v54  ;;  %v592_v54 = vld [vmem:[%s2798_s17 + $0x10] sm:$0xf] }
 0x3f0   : > { %2238 = vmatprep.mubr.msk.f32.mxu0 %vm2432_vm1, %v2433_v7  ;;  %2355 = vmatpush3.bf16.msra.mxu0 %v2354_v1 }
 0x3f1   : > { %2356 = vmatprep.subr.bf16.mxu0 %v2431_v4 }
 0x3f4   : > { %2358 = vmatpush3.bf16.msra.mxu0 %v2357_v3 }
 0x3f5   : > { %2365 = vmatprep.subr.bf16.mxu0 %v2431_v4 }
 0x3f7   : > { %2239 = vmatmul.mubr.msk.f32.vlgmr.msra.gmra.mrb[4].mxu0 %vm606_vm2, %v593_v12 }
 0x3f8   : > { %2241 = vmatprep.mubr.msk.f32.mxu0 %vm2432_vm1, %v2433_v7 }
 0x3fb   : > { %2242 = vmatmul.mubr.msk.f32.gmra.mrb[6].mxu0 %vm606_vm2, %v594_v13  ;;  %v2075_v13 = vld [vmem:[%s2529_s21 + $0x60] sm:$0xff] }
 0x3fc   : > { %2244 = vmatprep.mubr.msk.f32.mxu0 %vm2432_vm1, %v2433_v7  ;;  %v2373_v16 = vpack.c.bf16 %v2076_v14, %v2075_v13 }
 0x3ff   : > { %2245 = vmatmul.mubr.msk.f32.gmra.mrb[8].mxu0 %vm606_vm2, %v595_v17  ;;  %v2078_v17 = vld [vmem:[%s2529_s21 + $0x78] sm:$0xff] }
 0x400   : > { %2270 = vmatprep.mubr.msk.f32.mxu0 %vm2432_vm1, %v2433_v7  ;;  %v2376_v18 = vpack.c.bf16 %v2078_v17, %v2077_v15 }
 0x4c2   : > { %v1084_v57 = vpop.f32.mrb[2].mxu0 }
 0x4c3   : > { %v1085_v58 = vadd.f32 %v2047_v56, %v1084_v57  ;;  %v2218_v59 = vpop.f32.mrb[3].mxu0 }
 0x4c5   : > { %v1088_v60 = vadd.f32 %v1085_v58, %v2576_v9  ;;  %v2065_v58 = vld [vmem:[%s2534_s24 + $0x2] ss:$0 sm:$0xff] }
 0x4c7   : > { %v1091_v61 = vsel %vm606_vm2, %v1088_v60, 0.0 }
 0x4c8   : > { %1092 = vadd.xlane.f32.xlu1 %v1091_v61 }
 0x4ca   : > { %v1283_v32 = vpop.f32.mrb[4].mxu0 }
 0x4cb   : > { %v2240_v33 = vpop.f32.mrb[5].mxu0  ;;  %v1284_v34 = vadd.f32 %v2057_v31, %v1283_v32 }
 0x4ce   : > { %v1288_v35 = vpop.f32.mrb[6].mxu0 }
 0x4cf   : > { %v1289_v36 = vadd.f32 %v2057_v31, %v1288_v35  ;;  %v2243_v37 = vpop.f32.mrb[7].mxu0  ;;  %v1677_v35 = vld [vmem:[%s2544_s16] sm:$0xff] }
 0x4d1   : > { %v2366_v38 = vpack.c.bf16 %v1289_v36, %v1284_v34  ;;  %v1678_v36 = vld [vmem:[%s2544_s16 + $0x8] sm:$0xff] }
 0x4d2   : > { %v2379_v37 = vpack.c.bf16 %v1678_v36, %v1677_v35 }
 0x4d3   : > { %2368 = vmatpush3.bf16.xpose.msk.msra.mxu0 %vm2367_vm4, %v2366_v38  ;;  %v1680_v38 = vld [vmem:[%s2544_s16 + $0x18] sm:$0xff] }
 0x4d4   : > { %2268 = vmatprep.subr.mxu0 %v2433_v7 }
 0x555   : > { %v1093_v5 = vpop.xlane.xlu1 %1092 }
 0x556   : > { %v1095_v6 = vmul.f32 0.03125, %v1093_v5 }
 0x558   : > { %v1096_v8 = vsub.f32 %v1088_v60, %v1095_v6 }
 0x55a   : > { %v1097_v9 = vmul.f32 %v1096_v8, %v1096_v8 }
 0x55c   : > { %v1098_v11 = vsel %vm606_vm2, %v1097_v9, 0.0 }
 0x55d   : > { %1099 = vadd.xlane.f32.xlu1 %v1098_v11 }
 0x5ea   : > { %v1100_v21 = vpop.xlane.xlu1 %1099 }
 0x5eb   : > { %v1101_v22 = vmul.f32 0.03125, %v1100_v21 }
 0x5ed   : > { %v1102_v23 = vadd.f32 1e-05, %v1101_v22 }
 0x5ef   : > { %2412 = vrsqrt.f32 %v1102_v23 }
 0x5f9   : > { %v2413_v24 = vpop.eup %2412 }
 0x5fa   : > { %v1104_v26 = vmul.f32 %v2413_v24, %v1096_v8  ;;  %v2079_v24 = vld [vmem:[%s2534_s24 + $0x3] ss:$0 sm:$0xff] }
 0x5fc   : > { %v1109_v28 = vmul.f32 %v2049_v25, %v1104_v26 }
 0x5fe   : > { %v2668_v29 = vadd.f32 %v2050_v27, %v1109_v28 }
 0x600   : > { %v1115_v30 = vadd.f32 %v2668_v29, %v2581_v10  ;;  %v1293_v10 = vpop.f32.mrb[8].mxu0 }
 0x601   : > { %v1294_v39 = vadd.f32 %v2057_v31, %v1293_v10  ;;  %v2246_v40 = vpop.f32.mrb[9].mxu0 }
 0x602   : > { %2228 = vmatmul.mubr.msk.f32.vlgmr.msra.gmra.mrb[8].mxu1 %vm606_vm2, %v1115_v30  ;;  %v1763_v40 = vld [vmem:[%s2550_s28 + $0x8] sm:$0xff] }
 0x603   : > { %2255 = vmatprep.mubr.msk.f32.mxu1 %vm2432_vm1, %v2433_v7  ;;  %2269 = vmatpush3.xpose.msk.msra.mxu0 %vm606_vm2, %v1294_v39  ;;  %v1762_v39 = vld [vmem:[%s2550_s28] sm:$0xff] }
 0x604   : > { %2372 = vmatprep.subr.bf16.mxu0 %v2431_v4  ;;  %2361 = vmatpush3.bf16.msra.mxu1 %v2360_v49 }
 0x605   : > { %2362 = vmatprep.subr.bf16.mxu1 %v2431_v4 }
 0x608   : > { %2364 = vmatpush3.bf16.msra.mxu1 %v2363_v51 }
 0x609   : > { %2369 = vmatprep.subr.bf16.mxu1 %v2431_v4 }
 0x60b   : > { %2256 = vmatmul.mubr.msk.f32.vlgmr.msra.gmra.mrb[10].mxu1 %vm606_vm2, %v590_v52  ;;  %v2081_v52 = vld [vmem:[%s2559_s13 + $0x1] ss:$0 sm:$0xff] }
 0x60c   : > { %2258 = vmatprep.mubr.msk.f32.mxu1 %vm2432_vm1, %v2433_v7 }
 0x60f   : > { %2259 = vmatmul.mubr.msk.f32.gmra.mrb[12].mxu1 %vm606_vm2, %v591_v53 }
 0x610   : > { %2261 = vmatprep.mubr.msk.f32.mxu1 %vm2432_vm1, %v2433_v7 }
 0x613   : > { %2262 = vmatmul.mubr.msk.f32.gmra.mrb[14].mxu1 %vm606_vm2, %v592_v54  ;;  %v2082_v54 = vld [vmem:[%s2564_s1 + $0x1] ss:$0 sm:$0xff] }
 0x614   : > { %2279 = vmatprep.mubr.msk.f32.mxu1 %vm2432_vm1, %v2433_v7 }
 0x6d5   : > { %v1194_v42 = vpop.f32.mrb[8].mxu1 }
 0x6d6   : > { %v1195_v43 = vadd.f32 %v2051_v41, %v1194_v42  ;;  %v2229_v44 = vpop.f32.mrb[9].mxu1  ;;  %v1764_v41 = vld [vmem:[%s2550_s28 + $0x10] sm:$0xff]  ;;  %v2385_v42 = vpack.c.bf16 %v1763_v40, %v1762_v39 }
 0x6d8   : > { %v1396_v45 = vmul.f32 0.17677669, %v1195_v43  ;;  %v1765_v43 = vld [vmem:[%s2550_s28 + $0x18] sm:$0xff] }
 0x6d9   : > { %v2388_v44 = vpack.c.bf16 %v1765_v43, %v1764_v41 }
 0x6da   : > { %2271 = vmatmul.mubr.msk.f32.vlgmr.msra.gmra.mrb[10].mxu0 %vm606_vm2, %v1396_v45  ;;  %v1766_v45 = vld [vmem:[%s2550_s28 + $0x20] sm:$0xff] }
 0x6db   : > { %2290 = vmatprep.mubr.msk.f32.mxu0 %vm2432_vm1, %v2433_v7  ;;  %2374 = vmatpush3.bf16.msra.mxu0 %v2373_v16  ;;  %v2391_v47 = vpack.c.bf16 %v1767_v46, %v1766_v45 }
 0x6dc   : > { %2375 = vmatprep.subr.bf16.mxu0 %v2431_v4 }
 0x6de   : > { %v1382_v59 = vpop.f32.mrb[10].mxu1 }
 0x6df   : > { %v2257_v60 = vpop.f32.mrb[11].mxu1  ;;  %v1383_v61 = vadd.f32 %v2065_v58, %v1382_v59  ;;  %2377 = vmatpush3.bf16.msra.mxu0 %v2376_v18  ;;  %v2087_v18 = vld [vmem:[%s2559_s13 + $0x2] ss:$0 sm:$0xff] }
 0x6e0   : > { %2384 = vmatprep.subr.bf16.mxu0 %v2431_v4 }
 0x6e2   : > { %v1387_v62 = vpop.f32.mrb[12].mxu1 }
 0x6e3   : > { %v1388_v63 = vadd.f32 %v2065_v58, %v1387_v62  ;;  %v2260_v0 = vpop.f32.mrb[13].mxu1 }
 0x6e4   : > { %v2085_v0 = vld [vmem:[%s573_s23] ss:$0 sm:$0xff]  ;;  %s2800_s23 = sld [smem:[#allocation9_spill]] }
 0x6e5   : > { %v2370_v1 = vpack.c.bf16 %v1388_v63, %v1383_v61 }
 0x6e6   : > { %v1392_v9 = vpop.f32.mrb[14].mxu1 }
 0x6e7   : > { %2371 = vmatpush3.bf16.msra.mxu1 %v2370_v1  ;;  %v2263_v11 = vpop.f32.mrb[15].mxu1  ;;  %v1393_v12 = vadd.f32 %v2065_v58, %v1392_v9  ;;  %v1769_v58 = vld [vmem:[%s2550_s28 + $0x38] sm:$0xff] }
 0x6e8   : > { %2277 = vmatprep.subr.mxu1 %v2433_v7 }
 0x6eb   : > { %2278 = vmatpush3.msk.msra.mxu1 %vm1494_vm6, %v1393_v12 }
 0x6ec   : > { %2378 = vmatprep.subr.bf16.mxu1 %v2431_v4 }
 0x7ad   : > { %v1475_v55 = vpop.f32.mrb[10].mxu0 }
 0x7ae   : > { %v2272_v56 = vpop.f32.mrb[11].mxu0  ;;  %v1480_v57 = vsel %vm1479_vm5, %v1475_v55, -inf }
 0x7af   : > { %1481 = vmax.xlane.f32.xlu0 %v1480_v57  ;;  %v1768_v57 = vld [vmem:[%s2550_s28 + $0x30] sm:$0xff] }
 0x7b0   : > { %v2394_v59 = vpack.c.bf16 %v1769_v58, %v1768_v57 }
 0x83c   : > { %v1482_v2 = vpop.xlane.xlu0 %1481 }
 0x83d   : > { %v1483_v3 = vsub.f32 %v1475_v55, %v1482_v2 }
 0x83f   : > { %v1484_v5 = vmul.f32 1.442695, %v1483_v3 }
 0x841   : > { %2414 = vpow2.f32 %v1484_v5 }
 0x84b   : > { %v2415_v6 = vpop.eup %2414 }
 0x84c   : > { %v1486_v8 = vsel %vm1479_vm5, %v2415_v6, 0.0 }
 0x84d   : > { %1487 = vadd.xlane.f32.xlu1 %v1486_v8 }
 0x8da   : > { %v1488_v19 = vpop.xlane.xlu1 %1487 }
 0x8db   : > { %2416 = vrcp.f32 %v1488_v19 }
 0x8e5   : > { %v2417_v20 = vpop.eup %2416 }
 0x8e6   : > { %v1490_v21 = vmul.f32 %v2417_v20, %v2415_v6  ;;  %v2088_v20 = vld [vmem:[%s2564_s1 + $0x2] ss:$0 sm:$0xff] }
 0x8e8   : > { %2280 = vmatmul.mubr.msk.f32.vlgmr.msra.gmra.mrb[16].mxu1 %vm1479_vm5, %v1490_v21 }
 0x8e9   : > { %2301 = vmatprep.mubr.msk.f32.mxu1 %vm2432_vm1, %v2433_v7  ;;  %2380 = vmatpush3.bf16.msra.mxu1 %v2379_v37 }
 0x8ea   : > { %2381 = vmatprep.subr.bf16.mxu1 %v2431_v4 }
 0x9bb   : > { %v1564_v22 = vpop.f32.mrb[16].mxu1 }
 0x9bc   : > { %v2281_v23 = vpop.f32.mrb[17].mxu1  ;;  %2291 = vmatmul.mubr.msk.f32.vlgmr.msra.gmra.mrb[12].mxu0 %vm606_vm2, %v1564_v22 }
 0x9bd   : > { %2320 = vmatprep.mubr.msk.f32.mxu0 %vm2432_vm1, %v2433_v7  ;;  %2386 = vmatpush3.bf16.msra.mxu0 %v2385_v42 }
 0x9be   : > { %2387 = vmatprep.subr.bf16.mxu0 %v2431_v4 }
 0x9c1   : > { %2389 = vmatpush3.bf16.msra.mxu0 %v2388_v44 }
 0x9c2   : > { %2390 = vmatprep.subr.bf16.mxu0 %v2431_v4 }
 0x9c5   : > { %2392 = vmatpush3.bf16.msra.mxu0 %v2391_v47 }
 0x9c6   : > { %2393 = vmatprep.subr.bf16.mxu0 %v2431_v4 }
 0x9c9   : > { %2395 = vmatpush3.bf16.msra.mxu0 %v2394_v59 }
 0xa8f   : > { %v1647_v25 = vpop.f32.mrb[12].mxu0 }
 0xa90   : > { %v1648_v26 = vadd.f32 %v2079_v24, %v1647_v25  ;;  %v2292_v27 = vpop.f32.mrb[13].mxu0 }
 0xa92   : > { %v1651_v28 = vadd.f32 %v1648_v26, %v2668_v29  ;;  %v1679_v29 = vld [vmem:[%s2544_s16 + $0x10] sm:$0xff]  ;;  %s2799_s16 = scalar_lea.vmem %s2779_s8, %s2512_s27 }
 0xa93   : > { %v2382_v10 = vpack.c.bf16 %v1680_v38, %v1679_v29  ;;  %v2083_v4 = vld [vmem:[%s2799_s16] ss:$0 sm:$0xff] }
 0xa94   : > { %v1654_v30 = vsel %vm606_vm2, %v1651_v28, 0.0 }
 0xa95   : > { %1655 = vadd.xlane.f32.xlu0 %v1654_v30  ;;  %2383 = vmatpush3.bf16.msra.mxu1 %v2382_v10 }
 0xb22   : > { %v1656_v31 = vpop.xlane.xlu0 %1655 }
 0xb23   : > { %v1657_v32 = vmul.f32 0.03125, %v1656_v31 }
 0xb25   : > { %v1658_v33 = vsub.f32 %v1651_v28, %v1657_v32 }
 0xb27   : > { %v1659_v34 = vmul.f32 %v1658_v33, %v1658_v33 }
 0xb29   : > { %v1660_v7 = vsel %vm606_vm2, %v1659_v34, 0.0 }
 0xb2a   : > { %1661 = vadd.xlane.f32.xlu1 %v1660_v7 }
 0xbb7   : > { %v1662_v48 = vpop.xlane.xlu1 %1661 }
 0xbb8   : > { %v1663_v49 = vmul.f32 0.03125, %v1662_v48 }
 0xbba   : > { %v1664_v50 = vadd.f32 1e-05, %v1663_v49 }
 0xbbc   : > { %2418 = vrsqrt.f32 %v1664_v50 }
 0xbc6   : > { %v2419_v51 = vpop.eup %2418 }
 0xbc7   : > { %v1666_v53 = vmul.f32 %v2419_v51, %v1658_v33 }
 0xbc9   : > { %v1671_v55 = vmul.f32 %v2081_v52, %v1666_v53 }
 0xbcb   : > { %v1676_v56 = vadd.f32 %v2082_v54, %v1671_v55 }
 0xbcd   : > { %2302 = vmatmul.mubr.msk.f32.vlgmr.msra.gmra.mrb[18].mxu1 %vm606_vm2, %v1676_v56 }
 0xca0   : > { %v1757_v60 = vpop.f32.mrb[18].mxu1 }
 0xca1   : > { %v1758_v61 = vadd.f32 %v2083_v4, %v1757_v60  ;;  %v2303_v62 = vpop.f32.mrb[19].mxu1 }
 0xca3   : > { %v1761_v63 = vmax.f32 %v1758_v61, 0.0 }
 0xca5   : > { %2321 = vmatmul.mubr.msk.f32.vlgmr.msra.gmra.mrb[14].mxu0 %vm1777_vm7, %v1761_v63 }
 0xd78   : > { %v1847_v1 = vpop.f32.mrb[14].mxu0 }
 0xd79   : > { %v1848_v2 = vadd.f32 %v2085_v0, %v1847_v1  ;;  %v2322_v3 = vpop.f32.mrb[15].mxu0 }
 0xd7b   : > { %v1851_v5 = vadd.f32 %v1848_v2, %v1676_v56 }
 0xd7d   : > { %v1854_v6 = vsel %vm606_vm2, %v1851_v5, 0.0 }
 0xd7e   : > { %1855 = vadd.xlane.f32.xlu0 %v1854_v6 }
 0xe0b   : > { %v1856_v8 = vpop.xlane.xlu0 %1855 }
 0xe0c   : > { %v1857_v9 = vmul.f32 0.03125, %v1856_v8 }
 0xe0e   : > { %v1858_v11 = vsub.f32 %v1851_v5, %v1857_v9 }
 0xe10   : > { %v1859_v12 = vmul.f32 %v1858_v11, %v1858_v11 }
 0xe12   : > { %v1860_v13 = vsel %vm606_vm2, %v1859_v12, 0.0 }
 0xe13   : > { %1861 = vadd.xlane.f32.xlu1 %v1860_v13 }
 0xea0   : > { %v1862_v14 = vpop.xlane.xlu1 %1861 }
 0xea1   : > { %v1863_v15 = vmul.f32 0.03125, %v1862_v14 }
 0xea3   : > { %v1864_v16 = vadd.f32 1e-05, %v1863_v15 }
 0xea5   : > { %2420 = vrsqrt.f32 %v1864_v16 }
 0xeaf   : > { %v2421_v17 = vpop.eup %2420 }
 0xeb0   : > { %v1866_v19 = vmul.f32 %v2421_v17, %v1858_v11 }
 0xeb2   : > { %v1871_v21 = vmul.f32 %v2087_v18, %v1866_v19 }
 0xeb4   : > { %v1876_v22 = vadd.f32 %v2088_v20, %v1871_v21 }
 0xeb6   : > { %1877 = vst.msk [vmem:[#allocation2] sm:$0xff] %vm606_vm2, %v1876_v22  ;;  %1878 = vst.msk [vmem:[%s2800_s23] sm:$0xff] %vm606_vm2, %v1876_v22 }
 0xeb7 PF: > { %s2801_s5 = sld [smem:[#allocation3_spill]] }
 0xebd   : > { %s23_s25 = sadd.s32 1, %s2801_s5  }
 0xebe   : > { %p20_p5 = scmp.ge.s32.totalorder %s23_s25, 4  }
 0xec0   :  { %22 = sbr.rel (!%p20_p5) target bundleno = 7 (0x7), region = 135 }

</bundles_post_ra>
